<compile_context>
chip_gen: v5e
topology: v5e:2x2
jax: 0.10.0
libtpu: 0.0.40
codegen_flags: <defaults>
</compile_context>

<pallas_src>
import functools

import jax
import jax.numpy as jnp
from jax.experimental import pallas as pl
from jax.experimental.pallas import tpu as pltpu

EPS = 1e-5
HPAD = 8  # top/bottom H padding inside the VMEM scratch; 8 keeps every ref store aligned


def _band_matrix(w9, width):
    """Pack a 3x3 conv kernel (tap-major (9, cin, cout), k = 3*dy+dx) into ONE fused banded
    matrix of shape (3*width*cin, width*cout).

    Row index = dy*(width*cin) + wi*cin + ci; entry = w[dy, wi - wo + 1, ci, co] when
    0 <= wi-wo+1 <= 2, else 0. The W-boundary zero padding is absorbed into the band
    structure; the H-boundary padding is handled by the in-kernel padded scratch. One whole
    set of image rows of the conv is   out = im2col_rows @ M   (single MXU matmul).
    """
    cin, cout = w9.shape[1], w9.shape[2]
    w = w9.reshape(3, 3, cin, cout)
    wi = jnp.arange(width)[:, None]                       # input column
    wo = jnp.arange(width)[None, :]                       # output column
    dx = wi - wo + 1
    valid = (dx >= 0) & (dx <= 2)
    m = w[:, jnp.clip(dx, 0, 2)]                          # (3, W, W, cin, cout)
    m = jnp.where(valid[None, :, :, None, None], m, 0.0)
    m = jnp.transpose(m, (0, 1, 3, 2, 4))                 # (3, W, cin, W, cout)
    return m.reshape(3 * width * cin, width * cout)


def _spec(shape):
    nd = len(shape)
    return pl.BlockSpec(shape, lambda i, nd=nd: (0,) * nd)


def _special_block_kernel(x_ref, m1d_ref, m2_ref, bn1_ref, bn2d_ref,
                          rin_ref, rint_ref, rout_ref, routt_ref,
                          out_ref, hpad_ref, *, n, h, w):
    rows = n * h
    inv_nhw = 1.0 / float(n * h * w)
    wcin = x_ref.shape[-1]          # W * Cin
    wcout = out_ref.shape[-1]       # W * Cout

    def bn_multi(ys, gammas, betas, r_ref, rt_ref):
        # Training-mode BN for k tensors sharing the same channel layout, in the flat
        # (rows, W*C) layout. One gather matmul for all sums/sum-of-squares, one scatter
        # matmul for all [scale; shift] rows (gamma folded into scale, mean*scale into shift).
        k = len(ys)
        stats = []
        for y in ys:
            stats.append(jnp.sum(y, axis=0, keepdims=True))          # (1, W*C)
            stats.append(jnp.sum(y * y, axis=0, keepdims=True))      # (1, W*C)
        stats_c = jnp.dot(jnp.concatenate(stats, axis=0), r_ref[...],
                          preferred_element_type=jnp.float32) * inv_nhw   # (2k, C)
        sc = []
        for i in range(k):
            mean_c = stats_c[2 * i:2 * i + 1, :]
            var_c = stats_c[2 * i + 1:2 * i + 2, :] - mean_c * mean_c      # E[y^2]-mean^2
            scale_c = gammas[i] * jax.lax.rsqrt(var_c + EPS)
            sc += [scale_c, betas[i] - mean_c * scale_c]
        sc_f = jnp.dot(jnp.concatenate(sc, axis=0), rt_ref[...],
                       preferred_element_type=jnp.float32)                 # (2k, W*C)
        return [ys[i] * sc_f[2 * i:2 * i + 1, :] + sc_f[2 * i + 1:2 * i + 2, :]
                for i in range(k)]

    # ---- zero ONLY the halo rows of the padded scratch (interior is overwritten below) ----
    hpad_ref[:, :HPAD, :] = jnp.zeros((n, HPAD, wcin), jnp.float32)
    hpad_ref[:, HPAD + h:HPAD + h + HPAD, :] = jnp.zeros((n, HPAD, wcin), jnp.float32)
    hpad_ref[:, HPAD:HPAD + h, :] = x_ref[...].reshape(n, h, wcin)

    def im2col():
        # (rows, 3*W*Cin): three H-shifted slabs read straight from the padded scratch and
        # lane-concatenated (no full-buffer materialization).
        return jnp.concatenate(
            [hpad_ref[:, HPAD - 1 + dy:HPAD - 1 + dy + h, :].reshape(rows, wcin)
             for dy in range(3)], axis=-1)

    # ---- stage 1: conv1 + downsample conv fused into ONE matmul (shared LHS) ----
    acc = jnp.dot(im2col(), m1d_ref[...], preferred_element_type=jnp.float32)
    accd = acc[:, :wcout]            # downsample branch (split sits on the 128-lane boundary)
    acc1 = acc[:, wcout:]            # conv1 branch

    # conv biases are omitted: a per-channel constant before training-mode BN cancels exactly.
    bn1p = bn1_ref[...]
    (h1,) = bn_multi([acc1], [bn1p[0:1, :]], [bn1p[1:2, :]], rin_ref, rint_ref)
    h1 = jnp.maximum(h1, 0.0)

    # ---- h1 never leaves VMEM: overwrite the scratch interior (halo rows stay zero) ----
    hpad_ref[:, HPAD:HPAD + h, :] = h1.reshape(n, h, wcin)

    # ---- stage 2: conv2 as ONE matmul ----
    acc2 = jnp.dot(im2col(), m2_ref[...], preferred_element_type=jnp.float32)

    # bn2 and bn_downsample share a single gather/scatter matmul pair (k=2).
    bn2dp = bn2d_ref[...]
    main, resid = bn_multi([acc2, accd],
                           [bn2dp[0:1, :], bn2dp[2:3, :]],
                           [bn2dp[1:2, :], bn2dp[3:4, :]],
                           rout_ref, routt_ref)

    out_ref[...] = jnp.maximum(main + resid, 0.0)        # lane-dense (N*H, W*Cout) store


@jax.jit
def special_block_forward(x_nchw, p):
    """x_nchw: (N, Cin, H, W) float32. Returns (N, Cout, H, W) float32."""
    x_nchw = x_nchw.astype(jnp.float32)
    n, cin, h, w = x_nchw.shape
    cout = p["w2"].shape[-1]
    wcin, wcout = w * cin, w * cout
    rows = n * h

    # Banded-matmul formulation only makes sense while the flattened width stays vreg-scale:
    # density is 3/W and weight footprint is O(W^2 * Cin * Cout). Guard it explicitly.
    assert wcin <= 512 and wcout <= 512, (
        "band matrices scale O(W^2*C^2); retile (W-tiled K=3*Cin dots) for larger W*C")

    # NCHW -> NHWC -> row-flattened (N*H, W*Cin): DMA layout matches the kernel's view.
    x2d = jnp.transpose(x_nchw, (0, 2, 3, 1)).reshape(rows, wcin)

    # Host-side prep (constants; folded by XLA): fused banded conv matrices + packed BN params.
    m1 = _band_matrix(p["w1"], w)                                       # (3*W*Cin, W*Cin)
    m2 = _band_matrix(p["w2"], w)                                       # (3*W*Cin, W*Cout)
    md = _band_matrix(p["wd"], w)                                       # (3*W*Cin, W*Cout)
    m1d = jnp.concatenate([md, m1], axis=1)       # md first -> 128-lane-aligned result split

    bn1 = jnp.stack([p["g1"], p["be1"]]).astype(jnp.float32)            # (2, Cin)
    bn2d = jnp.stack([p["g2"], p["be2"], p["gd"], p["bed"]]).astype(jnp.float32)  # (4, Cout)

    # Constant gather / scatter matrices for per-channel BN statistics in the flat layout.
    rin = jnp.tile(jnp.eye(cin, dtype=jnp.float32), (w, 1))             # (W*Cin, Cin)
    rint = jnp.tile(jnp.eye(cin, dtype=jnp.float32), (1, w))            # (Cin, W*Cin)
    rout = jnp.tile(jnp.eye(cout, dtype=jnp.float32), (w, 1))           # (W*Cout, Cout)
    routt = jnp.tile(jnp.eye(cout, dtype=jnp.float32), (1, w))          # (Cout, W*Cout)

    kernel = functools.partial(_special_block_kernel, n=n, h=h, w=w)

    flops = int(2 * rows * (3 * wcin) * (wcout + wcin)       # stage-1 fused matmul
                + 2 * rows * (3 * wcin) * wcout              # stage-2 matmul
                + 8 * rows * (wcin + 2 * wcout))             # BN / add / ReLU elementwise
    bytes_accessed = int(4 * (x2d.size + rows * wcout + m1d.size + m2.size + rin.size
                              + rint.size + rout.size + routt.size + bn1.size + bn2d.size))
    cost = pl.CostEstimate(flops=flops, transcendentals=int(cin + 2 * cout),
                           bytes_accessed=bytes_accessed)

    out2d = pl.pallas_call(
        kernel,
        out_shape=jax.ShapeDtypeStruct((rows, wcout), jnp.float32),
        grid=(1,),
        in_specs=[_spec(x2d.shape), _spec(m1d.shape), _spec(m2.shape),
                  _spec(bn1.shape), _spec(bn2d.shape),
                  _spec(rin.shape), _spec(rint.shape),
                  _spec(rout.shape), _spec(routt.shape)],
        out_specs=_spec((rows, wcout)),
        scratch_shapes=[pltpu.VMEM((n, h + 2 * HPAD, wcin), jnp.float32)],
        compiler_params=pltpu.CompilerParams(
            dimension_semantics=("arbitrary",),
            vmem_limit_bytes=32 * 1024 * 1024),
        cost_estimate=cost,
    )(x2d, m1d, m2, bn1, bn2d, rin, rint, rout, routt)

    out = out2d.reshape(n, h, w, cout)
    return jnp.transpose(out, (0, 3, 1, 2))               # back to NCHW


def init_params(key, in_chan, out_chan):
    ks = jax.random.split(key, 12)

    def conv_w(k, cin, co):
        wts = 0.1 * jax.random.normal(k, (3, 3, cin, co), jnp.float32)
        return wts.reshape(9, cin, co)  # tap-major layout, k = 3*dy + dx

    return dict(
        w1=conv_w(ks[0], in_chan, in_chan),
        b1=0.05 * jax.random.normal(ks[1], (in_chan,), jnp.float32),
        g1=1.0 + 0.1 * jax.random.normal(ks[2], (in_chan,), jnp.float32),
        be1=0.1 * jax.random.normal(ks[3], (in_chan,), jnp.float32),
        w2=conv_w(ks[4], in_chan, out_chan),
        b2=0.05 * jax.random.normal(ks[5], (out_chan,), jnp.float32),
        g2=1.0 + 0.1 * jax.random.normal(ks[6], (out_chan,), jnp.float32),
        be2=0.1 * jax.random.normal(ks[7], (out_chan,), jnp.float32),
        wd=conv_w(ks[8], in_chan, out_chan),  # downsample conv, bias=False
        gd=1.0 + 0.1 * jax.random.normal(ks[9], (out_chan,), jnp.float32),
        bed=0.1 * jax.random.normal(ks[10], (out_chan,), jnp.float32),
    )


def reference_forward(x_nchw, p):
    """Pure-JAX (XLA) reference mirroring the PyTorch SpecialBlock forward (train-mode BN)."""
    def conv(x, w9, bias=None):
        cin, co = w9.shape[1], w9.shape[2]
        w = w9.reshape(3, 3, cin, co)
        y = jax.lax.conv_general_dilated(
            x, w, window_strides=(1, 1), padding="SAME",
            dimension_numbers=("NHWC", "HWIO", "NHWC"))
        return y if bias is None else y + bias

    def bn(y, gamma, beta):
        mean = jnp.mean(y, axis=(0, 1, 2), keepdims=True)
        var = jnp.mean((y - mean) ** 2, axis=(0, 1, 2), keepdims=True)
        return gamma * (y - mean) * jax.lax.rsqrt(var + EPS) + beta

    x = jnp.transpose(x_nchw, (0, 2, 3, 1)).astype(jnp.float32)
    h1 = jax.nn.relu(bn(conv(x, p["w1"], p["b1"]), p["g1"], p["be1"]))
    main = bn(conv(h1, p["w2"], p["b2"]), p["g2"], p["be2"])
    resid = bn(conv(x, p["wd"]), p["gd"], p["bed"])
    out = jax.nn.relu(main + resid)
    return jnp.transpose(out, (0, 3, 1, 2))


if __name__ == "__main__":
    # stride must be 1: the PyTorch module only strides the downsample branch, so stride != 1
    # would shape-mismatch the residual add anyway.
    N, CIN, COUT, H, W = 2, 4, 8, 16, 16

    key = jax.random.PRNGKey(0)
    kx, kp = jax.random.split(key)
    x = jax.random.normal(kx, (N, CIN, H, W), jnp.float32)
    params = init_params(kp, CIN, COUT)

    out = jax.block_until_ready(special_block_forward(x, params))
    ref = jax.block_until_ready(reference_forward(x, params))

    assert out.shape == (N, COUT, H, W), out.shape
    if not jnp.allclose(out, ref, atol=1e-3, rtol=1e-3):
        max_err = float(jnp.max(jnp.abs(out - ref)))
        raise AssertionError(f"Pallas output mismatch vs reference, max|err|={max_err}")

    print("KERNEL_OK")
</pallas_src>

<mosaic_0001>
module attributes {stable_mosaic.version = 11 : i64} {
  func.func @_special_block_kernel(%arg0: i32, %arg1: memref<32x64xf32, #tpu.memory_space<vmem>>, %arg2: memref<192x192xf32, #tpu.memory_space<vmem>>, %arg3: memref<192x128xf32, #tpu.memory_space<vmem>>, %arg4: memref<2x4xf32, #tpu.memory_space<vmem>>, %arg5: memref<4x8xf32, #tpu.memory_space<vmem>>, %arg6: memref<64x4xf32, #tpu.memory_space<vmem>>, %arg7: memref<4x64xf32, #tpu.memory_space<vmem>>, %arg8: memref<128x8xf32, #tpu.memory_space<vmem>>, %arg9: memref<8x128xf32, #tpu.memory_space<vmem>>, %arg10: memref<32x128xf32, #tpu.memory_space<vmem>>, %arg11: memref<2x32x64xf32, #tpu.memory_space<vmem>>) attributes {dimension_semantics = [#tpu.dimension_semantics<arbitrary>], iteration_bounds = array<i64: 1>, scalar_prefetch = 0 : i64, scratch_operands = 1 : i64, tpu.core_type = #tpu.core_type<tc>, window_params = [{pipeline_mode = #tpu.pipeline_mode<synchronous>, transform_indices = @transform_0, window_bounds = array<i64: 32, 64>}, {pipeline_mode = #tpu.pipeline_mode<synchronous>, transform_indices = @transform_1, window_bounds = array<i64: 192, 192>}, {pipeline_mode = #tpu.pipeline_mode<synchronous>, transform_indices = @transform_2, window_bounds = array<i64: 192, 128>}, {pipeline_mode = #tpu.pipeline_mode<synchronous>, transform_indices = @transform_3, window_bounds = array<i64: 2, 4>}, {pipeline_mode = #tpu.pipeline_mode<synchronous>, transform_indices = @transform_4, window_bounds = array<i64: 4, 8>}, {pipeline_mode = #tpu.pipeline_mode<synchronous>, transform_indices = @transform_5, window_bounds = array<i64: 64, 4>}, {pipeline_mode = #tpu.pipeline_mode<synchronous>, transform_indices = @transform_6, window_bounds = array<i64: 4, 64>}, {pipeline_mode = #tpu.pipeline_mode<synchronous>, transform_indices = @transform_7, window_bounds = array<i64: 128, 8>}, {pipeline_mode = #tpu.pipeline_mode<synchronous>, transform_indices = @transform_8, window_bounds = array<i64: 8, 128>}, {pipeline_mode = #tpu.pipeline_mode<synchronous>, transform_indices = @transform_9, window_bounds = array<i64: 32, 128>}]} {
    %cst = arith.constant 0.000000e+00 : f32
    %0 = vector.broadcast %cst : f32 to vector<2x8x64xf32>
    %c0 = arith.constant 0 : index
    %c0_0 = arith.constant 0 : index
    %c0_1 = arith.constant 0 : index
    %1 = vector.load %arg11[%c0, %c0_0, %c0_1] : memref<2x32x64xf32, #tpu.memory_space<vmem>>, vector<2x8x64xf32>
    tpu.vector_store %arg11[%c0, %c0_0, %c0_1], %0 {strides = array<i32>} : memref<2x32x64xf32, #tpu.memory_space<vmem>>, vector<2x8x64xf32>,
    %cst_2 = arith.constant 0.000000e+00 : f32
    %2 = vector.broadcast %cst_2 : f32 to vector<2x8x64xf32>
    %c0_3 = arith.constant 0 : index
    %c24 = arith.constant 24 : index
    %c0_4 = arith.constant 0 : index
    %3 = vector.load %arg11[%c0_3, %c24, %c0_4] : memref<2x32x64xf32, #tpu.memory_space<vmem>>, vector<2x8x64xf32>
    tpu.vector_store %arg11[%c0_3, %c24, %c0_4], %2 {strides = array<i32>} : memref<2x32x64xf32, #tpu.memory_space<vmem>>, vector<2x8x64xf32>,
    %c0_5 = arith.constant 0 : index
    %c0_6 = arith.constant 0 : index
    %4 = vector.load %arg1[%c0_5, %c0_6] : memref<32x64xf32, #tpu.memory_space<vmem>>, vector<32x64xf32>
    %5 = vector.shape_cast %4 : vector<32x64xf32> to vector<2x16x64xf32>
    %c0_7 = arith.constant 0 : index
    %c8 = arith.constant 8 : index
    %c0_8 = arith.constant 0 : index
    %6 = vector.load %arg11[%c0_7, %c8, %c0_8] : memref<2x32x64xf32, #tpu.memory_space<vmem>>, vector<2x16x64xf32>
    tpu.vector_store %arg11[%c0_7, %c8, %c0_8], %5 {strides = array<i32>} : memref<2x32x64xf32, #tpu.memory_space<vmem>>, vector<2x16x64xf32>,
    %c0_9 = arith.constant 0 : index
    %c7 = arith.constant 7 : index
    %c0_10 = arith.constant 0 : index
    %7 = vector.load %arg11[%c0_9, %c7, %c0_10] : memref<2x32x64xf32, #tpu.memory_space<vmem>>, vector<2x16x64xf32>
    %8 = vector.shape_cast %7 : vector<2x16x64xf32> to vector<32x64xf32>
    %c0_11 = arith.constant 0 : index
    %c8_12 = arith.constant 8 : index
    %c0_13 = arith.constant 0 : index
    %9 = vector.load %arg11[%c0_11, %c8_12, %c0_13] : memref<2x32x64xf32, #tpu.memory_space<vmem>>, vector<2x16x64xf32>
    %10 = vector.shape_cast %9 : vector<2x16x64xf32> to vector<32x64xf32>
    %c0_14 = arith.constant 0 : index
    %c9 = arith.constant 9 : index
    %c0_15 = arith.constant 0 : index
    %11 = vector.load %arg11[%c0_14, %c9, %c0_15] : memref<2x32x64xf32, #tpu.memory_space<vmem>>, vector<2x16x64xf32>
    %12 = vector.shape_cast %11 : vector<2x16x64xf32> to vector<32x64xf32>
    %13 = tpu.concatenate %8, %10, %12 in 1 : vector<32x64xf32>, vector<32x64xf32>, vector<32x64xf32> -> vector<32x192xf32>
    %c0_16 = arith.constant 0 : index
    %c0_17 = arith.constant 0 : index
    %14 = vector.load %arg2[%c0_16, %c0_17] : memref<192x192xf32, #tpu.memory_space<vmem>>, vector<192x192xf32>
    %cst_18 = arith.constant dense<0.000000e+00> : vector<32x192xf32>
    %15 = tpu.matmul %13, %14, %cst_18 {dimension_numbers = #tpu.dot_dimension_numbers<[1], [0], [0], [1], [0, 0, 1, 1], [], []>} : vector<32x192xf32>, vector<192x192xf32>, vector<32x192xf32> -> vector<32x192xf32>
    %16 = vector.extract_strided_slice %15 {offsets = [0, 0], sizes = [32, 128], strides = [1, 1]} : vector<32x192xf32> to vector<32x128xf32>
    %17 = vector.extract_strided_slice %15 {offsets = [0, 128], sizes = [32, 64], strides = [1, 1]} : vector<32x192xf32> to vector<32x64xf32>
    %c0_19 = arith.constant 0 : index
    %c0_20 = arith.constant 0 : index
    %18 = vector.load %arg4[%c0_19, %c0_20] : memref<2x4xf32, #tpu.memory_space<vmem>>, vector<2x4xf32>
    %19 = vector.extract_strided_slice %18 {offsets = [0, 0], sizes = [1, 4], strides = [1, 1]} : vector<2x4xf32> to vector<1x4xf32>
    %20 = vector.extract_strided_slice %18 {offsets = [1, 0], sizes = [1, 4], strides = [1, 1]} : vector<2x4xf32> to vector<1x4xf32>
    %cst_21 = arith.constant dense<0.000000e+00> : vector<64xf32>
    %21 = vector.multi_reduction <add>, %17, %cst_21 [0] : vector<32x64xf32> to vector<64xf32>
    %22 = vector.shape_cast %21 : vector<64xf32> to vector<1x64xf32>
    %23 = arith.mulf %17, %17 : vector<32x64xf32>
    %cst_22 = arith.constant dense<0.000000e+00> : vector<64xf32>
    %24 = vector.multi_reduction <add>, %23, %cst_22 [0] : vector<32x64xf32> to vector<64xf32>
    %25 = vector.shape_cast %24 : vector<64xf32> to vector<1x64xf32>
    %26 = tpu.concatenate %22, %25 in 0 : vector<1x64xf32>, vector<1x64xf32> -> vector<2x64xf32>
    %c0_23 = arith.constant 0 : index
    %c0_24 = arith.constant 0 : index
    %27 = vector.load %arg6[%c0_23, %c0_24] : memref<64x4xf32, #tpu.memory_space<vmem>>, vector<64x4xf32>
    %cst_25 = arith.constant dense<0.000000e+00> : vector<2x4xf32>
    %28 = tpu.matmul %26, %27, %cst_25 {dimension_numbers = #tpu.dot_dimension_numbers<[1], [0], [0], [1], [0, 0, 1, 1], [], []>} : vector<2x64xf32>, vector<64x4xf32>, vector<2x4xf32> -> vector<2x4xf32>
    %cst_26 = arith.constant 0.001953125 : f32
    %29 = vector.broadcast %cst_26 : f32 to vector<2x4xf32>
    %30 = arith.mulf %28, %29 : vector<2x4xf32>
    %31 = vector.extract_strided_slice %30 {offsets = [0, 0], sizes = [1, 4], strides = [1, 1]} : vector<2x4xf32> to vector<1x4xf32>
    %32 = vector.extract_strided_slice %30 {offsets = [1, 0], sizes = [1, 4], strides = [1, 1]} : vector<2x4xf32> to vector<1x4xf32>
    %33 = arith.mulf %31, %31 : vector<1x4xf32>
    %34 = arith.subf %32, %33 : vector<1x4xf32>
    %cst_27 = arith.constant 9.99999974E-6 : f32
    %35 = vector.broadcast %cst_27 : f32 to vector<1x4xf32>
    %36 = arith.addf %34, %35 : vector<1x4xf32>
    %37 = math.rsqrt %36 : vector<1x4xf32>
    %38 = arith.mulf %19, %37 : vector<1x4xf32>
    %39 = arith.mulf %31, %38 : vector<1x4xf32>
    %40 = arith.subf %20, %39 : vector<1x4xf32>
    %41 = tpu.concatenate %38, %40 in 0 : vector<1x4xf32>, vector<1x4xf32> -> vector<2x4xf32>
    %c0_28 = arith.constant 0 : index
    %c0_29 = arith.constant 0 : index
    %42 = vector.load %arg7[%c0_28, %c0_29] : memref<4x64xf32, #tpu.memory_space<vmem>>, vector<4x64xf32>
    %cst_30 = arith.constant dense<0.000000e+00> : vector<2x64xf32>
    %43 = tpu.matmul %41, %42, %cst_30 {dimension_numbers = #tpu.dot_dimension_numbers<[1], [0], [0], [1], [0, 0, 1, 1], [], []>} : vector<2x4xf32>, vector<4x64xf32>, vector<2x64xf32> -> vector<2x64xf32>
    %44 = vector.extract_strided_slice %43 {offsets = [0, 0], sizes = [1, 64], strides = [1, 1]} : vector<2x64xf32> to vector<1x64xf32>
    %45 = vector.broadcast %44 : vector<1x64xf32> to vector<32x64xf32>
    %46 = arith.mulf %17, %45 : vector<32x64xf32>
    %47 = vector.extract_strided_slice %43 {offsets = [1, 0], sizes = [1, 64], strides = [1, 1]} : vector<2x64xf32> to vector<1x64xf32>
    %48 = vector.broadcast %47 : vector<1x64xf32> to vector<32x64xf32>
    %49 = arith.addf %46, %48 : vector<32x64xf32>
    %cst_31 = arith.constant 0.000000e+00 : f32
    %50 = vector.broadcast %cst_31 : f32 to vector<32x64xf32>
    %51 = arith.maximumf %49, %50 : vector<32x64xf32>
    %52 = vector.shape_cast %51 : vector<32x64xf32> to vector<2x16x64xf32>
    %c0_32 = arith.constant 0 : index
    %c8_33 = arith.constant 8 : index
    %c0_34 = arith.constant 0 : index
    %53 = vector.load %arg11[%c0_32, %c8_33, %c0_34] : memref<2x32x64xf32, #tpu.memory_space<vmem>>, vector<2x16x64xf32>
    tpu.vector_store %arg11[%c0_32, %c8_33, %c0_34], %52 {strides = array<i32>} : memref<2x32x64xf32, #tpu.memory_space<vmem>>, vector<2x16x64xf32>,
    %c0_35 = arith.constant 0 : index
    %c7_36 = arith.constant 7 : index
    %c0_37 = arith.constant 0 : index
    %54 = vector.load %arg11[%c0_35, %c7_36, %c0_37] : memref<2x32x64xf32, #tpu.memory_space<vmem>>, vector<2x16x64xf32>
    %55 = vector.shape_cast %54 : vector<2x16x64xf32> to vector<32x64xf32>
    %c0_38 = arith.constant 0 : index
    %c8_39 = arith.constant 8 : index
    %c0_40 = arith.constant 0 : index
    %56 = vector.load %arg11[%c0_38, %c8_39, %c0_40] : memref<2x32x64xf32, #tpu.memory_space<vmem>>, vector<2x16x64xf32>
    %57 = vector.shape_cast %56 : vector<2x16x64xf32> to vector<32x64xf32>
    %c0_41 = arith.constant 0 : index
    %c9_42 = arith.constant 9 : index
    %c0_43 = arith.constant 0 : index
    %58 = vector.load %arg11[%c0_41, %c9_42, %c0_43] : memref<2x32x64xf32, #tpu.memory_space<vmem>>, vector<2x16x64xf32>
    %59 = vector.shape_cast %58 : vector<2x16x64xf32> to vector<32x64xf32>
    %60 = tpu.concatenate %55, %57, %59 in 1 : vector<32x64xf32>, vector<32x64xf32>, vector<32x64xf32> -> vector<32x192xf32>
    %c0_44 = arith.constant 0 : index
    %c0_45 = arith.constant 0 : index
    %61 = vector.load %arg3[%c0_44, %c0_45] : memref<192x128xf32, #tpu.memory_space<vmem>>, vector<192x128xf32>
    %cst_46 = arith.constant dense<0.000000e+00> : vector<32x128xf32>
    %62 = tpu.matmul %60, %61, %cst_46 {dimension_numbers = #tpu.dot_dimension_numbers<[1], [0], [0], [1], [0, 0, 1, 1], [], []>} : vector<32x192xf32>, vector<192x128xf32>, vector<32x128xf32> -> vector<32x128xf32>
    %c0_47 = arith.constant 0 : index
    %c0_48 = arith.constant 0 : index
    %63 = vector.load %arg5[%c0_47, %c0_48] : memref<4x8xf32, #tpu.memory_space<vmem>>, vector<4x8xf32>
    %64 = vector.extract_strided_slice %63 {offsets = [0, 0], sizes = [1, 8], strides = [1, 1]} : vector<4x8xf32> to vector<1x8xf32>
    %65 = vector.extract_strided_slice %63 {offsets = [2, 0], sizes = [1, 8], strides = [1, 1]} : vector<4x8xf32> to vector<1x8xf32>
    %66 = vector.extract_strided_slice %63 {offsets = [1, 0], sizes = [1, 8], strides = [1, 1]} : vector<4x8xf32> to vector<1x8xf32>
    %67 = vector.extract_strided_slice %63 {offsets = [3, 0], sizes = [1, 8], strides = [1, 1]} : vector<4x8xf32> to vector<1x8xf32>
    %cst_49 = arith.constant dense<0.000000e+00> : vector<128xf32>
    %68 = vector.multi_reduction <add>, %62, %cst_49 [0] : vector<32x128xf32> to vector<128xf32>
    %69 = vector.shape_cast %68 : vector<128xf32> to vector<1x128xf32>
    %70 = arith.mulf %62, %62 : vector<32x128xf32>
    %cst_50 = arith.constant dense<0.000000e+00> : vector<128xf32>
    %71 = vector.multi_reduction <add>, %70, %cst_50 [0] : vector<32x128xf32> to vector<128xf32>
    %72 = vector.shape_cast %71 : vector<128xf32> to vector<1x128xf32>
    %cst_51 = arith.constant dense<0.000000e+00> : vector<128xf32>
    %73 = vector.multi_reduction <add>, %16, %cst_51 [0] : vector<32x128xf32> to vector<128xf32>
    %74 = vector.shape_cast %73 : vector<128xf32> to vector<1x128xf32>
    %75 = arith.mulf %16, %16 : vector<32x128xf32>
    %cst_52 = arith.constant dense<0.000000e+00> : vector<128xf32>
    %76 = vector.multi_reduction <add>, %75, %cst_52 [0] : vector<32x128xf32> to vector<128xf32>
    %77 = vector.shape_cast %76 : vector<128xf32> to vector<1x128xf32>
    %78 = tpu.concatenate %69, %72, %74, %77 in 0 : vector<1x128xf32>, vector<1x128xf32>, vector<1x128xf32>, vector<1x128xf32> -> vector<4x128xf32>
    %c0_53 = arith.constant 0 : index
    %c0_54 = arith.constant 0 : index
    %79 = vector.load %arg8[%c0_53, %c0_54] : memref<128x8xf32, #tpu.memory_space<vmem>>, vector<128x8xf32>
    %cst_55 = arith.constant dense<0.000000e+00> : vector<4x8xf32>
    %80 = tpu.matmul %78, %79, %cst_55 {dimension_numbers = #tpu.dot_dimension_numbers<[1], [0], [0], [1], [0, 0, 1, 1], [], []>} : vector<4x128xf32>, vector<128x8xf32>, vector<4x8xf32> -> vector<4x8xf32>
    %cst_56 = arith.constant 0.001953125 : f32
    %81 = vector.broadcast %cst_56 : f32 to vector<4x8xf32>
    %82 = arith.mulf %80, %81 : vector<4x8xf32>
    %83 = vector.extract_strided_slice %82 {offsets = [0, 0], sizes = [1, 8], strides = [1, 1]} : vector<4x8xf32> to vector<1x8xf32>
    %84 = vector.extract_strided_slice %82 {offsets = [1, 0], sizes = [1, 8], strides = [1, 1]} : vector<4x8xf32> to vector<1x8xf32>
    %85 = arith.mulf %83, %83 : vector<1x8xf32>
    %86 = arith.subf %84, %85 : vector<1x8xf32>
    %cst_57 = arith.constant 9.99999974E-6 : f32
    %87 = vector.broadcast %cst_57 : f32 to vector<1x8xf32>
    %88 = arith.addf %86, %87 : vector<1x8xf32>
    %89 = math.rsqrt %88 : vector<1x8xf32>
    %90 = arith.mulf %64, %89 : vector<1x8xf32>
    %91 = arith.mulf %83, %90 : vector<1x8xf32>
    %92 = arith.subf %66, %91 : vector<1x8xf32>
    %93 = vector.extract_strided_slice %82 {offsets = [2, 0], sizes = [1, 8], strides = [1, 1]} : vector<4x8xf32> to vector<1x8xf32>
    %94 = vector.extract_strided_slice %82 {offsets = [3, 0], sizes = [1, 8], strides = [1, 1]} : vector<4x8xf32> to vector<1x8xf32>
    %95 = arith.mulf %93, %93 : vector<1x8xf32>
    %96 = arith.subf %94, %95 : vector<1x8xf32>
    %cst_58 = arith.constant 9.99999974E-6 : f32
    %97 = vector.broadcast %cst_58 : f32 to vector<1x8xf32>
    %98 = arith.addf %96, %97 : vector<1x8xf32>
    %99 = math.rsqrt %98 : vector<1x8xf32>
    %100 = arith.mulf %65, %99 : vector<1x8xf32>
    %101 = arith.mulf %93, %100 : vector<1x8xf32>
    %102 = arith.subf %67, %101 : vector<1x8xf32>
    %103 = tpu.concatenate %90, %92, %100, %102 in 0 : vector<1x8xf32>, vector<1x8xf32>, vector<1x8xf32>, vector<1x8xf32> -> vector<4x8xf32>
    %c0_59 = arith.constant 0 : index
    %c0_60 = arith.constant 0 : index
    %104 = vector.load %arg9[%c0_59, %c0_60] : memref<8x128xf32, #tpu.memory_space<vmem>>, vector<8x128xf32>
    %cst_61 = arith.constant dense<0.000000e+00> : vector<4x128xf32>
    %105 = tpu.matmul %103, %104, %cst_61 {dimension_numbers = #tpu.dot_dimension_numbers<[1], [0], [0], [1], [0, 0, 1, 1], [], []>} : vector<4x8xf32>, vector<8x128xf32>, vector<4x128xf32> -> vector<4x128xf32>
    %106 = vector.extract_strided_slice %105 {offsets = [0, 0], sizes = [1, 128], strides = [1, 1]} : vector<4x128xf32> to vector<1x128xf32>
    %107 = vector.broadcast %106 : vector<1x128xf32> to vector<32x128xf32>
    %108 = arith.mulf %62, %107 : vector<32x128xf32>
    %109 = vector.extract_strided_slice %105 {offsets = [1, 0], sizes = [1, 128], strides = [1, 1]} : vector<4x128xf32> to vector<1x128xf32>
    %110 = vector.broadcast %109 : vector<1x128xf32> to vector<32x128xf32>
    %111 = arith.addf %108, %110 : vector<32x128xf32>
    %112 = vector.extract_strided_slice %105 {offsets = [2, 0], sizes = [1, 128], strides = [1, 1]} : vector<4x128xf32> to vector<1x128xf32>
    %113 = vector.broadcast %112 : vector<1x128xf32> to vector<32x128xf32>
    %114 = arith.mulf %16, %113 : vector<32x128xf32>
    %115 = vector.extract_strided_slice %105 {offsets = [3, 0], sizes = [1, 128], strides = [1, 1]} : vector<4x128xf32> to vector<1x128xf32>
    %116 = vector.broadcast %115 : vector<1x128xf32> to vector<32x128xf32>
    %117 = arith.addf %114, %116 : vector<32x128xf32>
    %118 = arith.addf %111, %117 : vector<32x128xf32>
    %cst_62 = arith.constant 0.000000e+00 : f32
    %119 = vector.broadcast %cst_62 : f32 to vector<32x128xf32>
    %120 = arith.maximumf %118, %119 : vector<32x128xf32>
    %c0_63 = arith.constant 0 : index
    %c0_64 = arith.constant 0 : index
    %121 = vector.load %arg10[%c0_63, %c0_64] : memref<32x128xf32, #tpu.memory_space<vmem>>, vector<32x128xf32>
    tpu.vector_store %arg10[%c0_63, %c0_64], %120 {strides = array<i32>} : memref<32x128xf32, #tpu.memory_space<vmem>>, vector<32x128xf32>,
    return
  }
  func.func @transform_0(%arg0: i32) -> (i32, i32) {
    %c0_i32 = arith.constant 0 : i32
    %c0_i32_0 = arith.constant 0 : i32
    %c0_i32_1 = arith.constant 0 : i32
    return %c0_i32, %c0_i32_0 : i32, i32
  }
  func.func @transform_1(%arg0: i32) -> (i32, i32) {
    %c0_i32 = arith.constant 0 : i32
    %c0_i32_0 = arith.constant 0 : i32
    %c0_i32_1 = arith.constant 0 : i32
    return %c0_i32, %c0_i32_0 : i32, i32
  }
  func.func @transform_2(%arg0: i32) -> (i32, i32) {
    %c0_i32 = arith.constant 0 : i32
    %c0_i32_0 = arith.constant 0 : i32
    %c0_i32_1 = arith.constant 0 : i32
    return %c0_i32, %c0_i32_0 : i32, i32
  }
  func.func @transform_3(%arg0: i32) -> (i32, i32) {
    %c0_i32 = arith.constant 0 : i32
    %c0_i32_0 = arith.constant 0 : i32
    %c0_i32_1 = arith.constant 0 : i32
    return %c0_i32, %c0_i32_0 : i32, i32
  }
  func.func @transform_4(%arg0: i32) -> (i32, i32) {
    %c0_i32 = arith.constant 0 : i32
    %c0_i32_0 = arith.constant 0 : i32
    %c0_i32_1 = arith.constant 0 : i32
    return %c0_i32, %c0_i32_0 : i32, i32
  }
  func.func @transform_5(%arg0: i32) -> (i32, i32) {
    %c0_i32 = arith.constant 0 : i32
    %c0_i32_0 = arith.constant 0 : i32
    %c0_i32_1 = arith.constant 0 : i32
    return %c0_i32, %c0_i32_0 : i32, i32
  }
  func.func @transform_6(%arg0: i32) -> (i32, i32) {
    %c0_i32 = arith.constant 0 : i32
    %c0_i32_0 = arith.constant 0 : i32
    %c0_i32_1 = arith.constant 0 : i32
    return %c0_i32, %c0_i32_0 : i32, i32
  }
  func.func @transform_7(%arg0: i32) -> (i32, i32) {
    %c0_i32 = arith.constant 0 : i32
    %c0_i32_0 = arith.constant 0 : i32
    %c0_i32_1 = arith.constant 0 : i32
    return %c0_i32, %c0_i32_0 : i32, i32
  }
  func.func @transform_8(%arg0: i32) -> (i32, i32) {
    %c0_i32 = arith.constant 0 : i32
    %c0_i32_0 = arith.constant 0 : i32
    %c0_i32_1 = arith.constant 0 : i32
    return %c0_i32, %c0_i32_0 : i32, i32
  }
  func.func @transform_9(%arg0: i32) -> (i32, i32) {
    %c0_i32 = arith.constant 0 : i32
    %c0_i32_0 = arith.constant 0 : i32
    %c0_i32_1 = arith.constant 0 : i32
    return %c0_i32, %c0_i32_0 : i32, i32
  }
}

</mosaic_0001>

<bundles_post_ra>
// kernel: tile.39
= control target key start
LH: loop header
LB: loop body
LE: loop exit
PB: predicated region body
PF: predicated region fallthrough
CT: control target
= control target key end

     0   :  { %vm6_vm0 = vcmask 1043458   ;;  %vm10_vm1 = vcmask 1045508   ;;  %vm14_vm2 = vcmask 1047558   ;;  %s19_s6 = smov 3  ;;  %s22_s7 = smov 12  ;;  %vm16_vm3 = vcmask 64512   ;;  %s736_s0 = inlined_call_operand.vmem [shape: f32[8,16,8], index: 0, kind: input, shape index: {}]   ;;  %s737_s1 = inlined_call_operand.vmem [shape: f32[8,128], index: 1, kind: output, shape index: {}]  }
   0x1   :  { %v348_v0 = vld [vmem:[%s736_s0 + $0xf] ss:$16 sm:%s19_s6]   ;;  %s27_s12 = smov 48  ;;  %s32_s13 = smov 192  ;;  %vm38_vm4 = vcmask 1048512   ;;  %vm60_vm5 = vcmask 982912  }
   0x2   :  { %v349_v1 = vld [vmem:[%s736_s0 + $0xf] ss:$16 sm:%s22_s7]   ;;  %s63_s18 = smov 3  ;;  %s66_s21 = smov 12  ;;  %vm82_vm6 = vcmask 917312   ;;  %vm104_vm7 = vcmask 851712  }
   0x3   :  { %v25_v2 = vsel %vm6_vm0, %v349_v1, %v348_v0  ;;  %v350_v3 = vld [vmem:[%s736_s0 + $0xf] ss:$16 sm:%s27_s12]   ;;  %v356_v6 = vld [vmem:[%s736_s0 + $0xd] ss:$16 sm:%s63_s18]   ;;  %s71_s22 = smov 48  ;;  %s76_s27 = smov 192 }
   0x4   :  { %v351_v4 = vld [vmem:[%s736_s0 + $0xf] ss:$16 sm:%s32_s13]   ;;  %v30_v5 = vsel %vm10_vm1, %v350_v3, %v25_v2  ;;  %v357_v8 = vld [vmem:[%s736_s0 + $0xd] ss:$16 sm:%s66_s21]   ;;  %s423_s28 = smov 120   ;;  %s41_s2 = smov 3 }
   0x5   :  { %v35_v7 = vsel %vm14_vm2, %v351_v4, %v30_v5  ;;  %v358_v9 = vld [vmem:[%s736_s0 + $0xd] ss:$16 sm:%s71_s22]   ;;  %v69_v10 = vsel %vm6_vm0, %v357_v8, %v356_v6  ;;  %s44_s3 = smov 12  ;;  %v352_v13 = vld [vmem:[%s736_s0 + $0xe] ss:$16 sm:%s41_s2]   ;;  %s49_s8 = smov 48 }
   0x6   :  { %36 = vrot.lane.b32.xlu0 %v35_v7, %s423_s28  ;;  %v359_v11 = vld [vmem:[%s736_s0 + $0xd] ss:$16 sm:%s76_s27]   ;;  %v74_v12 = vsel %vm10_vm1, %v358_v9, %v69_v10  ;;  %s54_s9 = smov 192  ;;  %s85_s14 = smov 3  ;;  %vm126_vm8 = vcmask 786112   ;;  %vm148_vm9 = vcmask 720512  }
   0x7   :  { %v353_v14 = vld [vmem:[%s736_s0 + $0xe] ss:$16 sm:%s44_s3]   ;;  %v79_v15 = vsel %vm14_vm2, %v359_v11, %v74_v12  ;;  %s424_s15 = smov 104   ;;  %v360_v20 = vld [vmem:[%s736_s0 + $0xc] ss:$16 sm:%s85_s14]   ;;  %s88_s18 = smov 12 }
   0x8   :  { %v47_v16 = vsel %vm6_vm0, %v353_v14, %v352_v13  ;;  %v354_v17 = vld [vmem:[%s736_s0 + $0xe] ss:$16 sm:%s49_s8]   ;;  %80 = vrot.lane.b32.xlu1 %v79_v15, %s424_s15  ;;  %s93_s19 = smov 48  ;;  %s98_s24 = smov 192  ;;  %vm170_vm10 = vcmask 654912   ;;  %vm192_vm11 = vcmask 589312  }
   0x9   :  { %v355_v18 = vld [vmem:[%s736_s0 + $0xe] ss:$16 sm:%s54_s9]   ;;  %v52_v19 = vsel %vm10_vm1, %v354_v17, %v47_v16  ;;  %v361_v21 = vld [vmem:[%s736_s0 + $0xc] ss:$16 sm:%s88_s18]   ;;  %s151_s27 = smov 3  ;;  %s154_s28 = smov 12 }
   0xa   :  { %v362_v22 = vld [vmem:[%s736_s0 + $0xc] ss:$16 sm:%s93_s19]   ;;  %v57_v23 = vsel %vm14_vm2, %v355_v18, %v52_v19  ;;  %v91_v24 = vsel %vm6_vm0, %v361_v21, %v360_v20  ;;  %v372_v27 = vld [vmem:[%s736_s0 + $0x9] ss:$16 sm:%s151_s27]   ;;  %s159_s4 = smov 48  ;;  %s164_s7 = smov 192 }
   0xb   :  { %v363_v25 = vld [vmem:[%s736_s0 + $0xc] ss:$16 sm:%s98_s24]   ;;  %v96_v26 = vsel %vm10_vm1, %v362_v22, %v91_v24  ;;  %v373_v28 = vld [vmem:[%s736_s0 + $0x9] ss:$16 sm:%s154_s28]   ;;  %s173_s8 = smov 3  ;;  %s425_s9 = smov 112  }
   0xc   :  { %v157_v29 = vsel %vm6_vm0, %v373_v28, %v372_v27  ;;  %v374_v30 = vld [vmem:[%s736_s0 + $0x9] ss:$16 sm:%s159_s4]   ;;  %v101_v31 = vsel %vm14_vm2, %v363_v25, %v96_v26  ;;  %v376_v32 = vld [vmem:[%s736_s0 + $0x8] ss:$16 sm:%s173_s8]   ;;  %s176_s12 = smov 12  ;;  %s181_s13 = smov 48 }
   0xd   :  { %v377_v33 = vld [vmem:[%s736_s0 + $0x8] ss:$16 sm:%s176_s12]   ;;  %s186_s16 = smov 192  ;;  %v162_v34 = vsel %vm10_vm1, %v374_v30, %v157_v29  ;;  %v375_v35 = vld [vmem:[%s736_s0 + $0x9] ss:$16 sm:%s164_s7]   ;;  %s217_s21 = smov 3 }
   0xe   :  { %58 = vrot.lane.b32.xlu0 %v57_v23, %s425_s9  ;;  %v179_v36 = vsel %vm6_vm0, %v377_v33, %v376_v32  ;;  %v378_v37 = vld [vmem:[%s736_s0 + $0x8] ss:$16 sm:%s181_s13]   ;;  %s220_s22 = smov 12  ;;  %s426_s23 = smov 96   ;;  %v167_v40 = vsel %vm14_vm2, %v375_v35, %v162_v34  ;;  %vm214_vm12 = vcmask 523712   ;;  %vm236_vm13 = vcmask 458112  }
   0xf   :  { %s225_s24 = smov 48  ;;  %v384_v38 = vld [vmem:[%s736_s0 + $0x6] ss:$16 sm:%s217_s21]   ;;  %s239_s29 = smov 3  ;;  %v184_v41 = vsel %vm10_vm1, %v378_v37, %v179_v36  ;;  %v379_v42 = vld [vmem:[%s736_s0 + $0x8] ss:$16 sm:%s186_s16]  }
  0x10   :  { %102 = vrot.lane.b32.xlu1 %v101_v31, %s426_s23  ;;  %v385_v39 = vld [vmem:[%s736_s0 + $0x6] ss:$16 sm:%s220_s22]   ;;  %s230_s3 = smov 192  ;;  %s242_s4 = smov 12  ;;  %v189_v47 = vsel %vm14_vm2, %v379_v42, %v184_v41  ;;  %vm258_vm14 = vcmask 392512   ;;  %vm280_vm15 = vcmask 326912  }
  0x11   :  { %v386_v43 = vld [vmem:[%s736_s0 + $0x6] ss:$16 sm:%s225_s24]   ;;  %s247_s7 = smov 48  ;;  %v223_v44 = vsel %vm6_vm0, %v385_v39, %v384_v38  ;;  %v388_v45 = vld [vmem:[%s736_s0 + $0x5] ss:$16 sm:%s239_s29]   ;;  %s107_s12 = smov 3 }
  0x12   :  { %v389_v46 = vld [vmem:[%s736_s0 + $0x5] ss:$16 sm:%s242_s4]   ;;  %s110_s13 = smov 12  ;;  %s427_s14 = smov 72   ;;  %v387_v48 = vld [vmem:[%s736_s0 + $0x6] ss:$16 sm:%s230_s3]   ;;  %v228_v52 = vsel %vm10_vm1, %v386_v43, %v223_v44 }
  0x13   :  { %v364_v49 = vld [vmem:[%s736_s0 + $0xb] ss:$16 sm:%s107_s12]   ;;  %s115_s19 = smov 48  ;;  %s120_s20 = smov 192  ;;  %v245_v53 = vsel %vm6_vm0, %v389_v46, %v388_v45  ;;  %v390_v54 = vld [vmem:[%s736_s0 + $0x5] ss:$16 sm:%s247_s7]   ;;  %v233_v61 = vsel %vm14_vm2, %v387_v48, %v228_v52 }
  0x14   :  { %s252_s21 = smov 192  ;;  %v365_v50 = vld [vmem:[%s736_s0 + $0xb] ss:$16 sm:%s110_s13]   ;;  %s283_s26 = smov 3  ;;  %v250_v62 = vsel %vm10_vm1, %v390_v54, %v245_v53 }
  0x15   :  { %v366_v51 = vld [vmem:[%s736_s0 + $0xb] ss:$16 sm:%s115_s19]   ;;  %v113_v55 = vsel %vm6_vm0, %v365_v50, %v364_v49  ;;  %s286_s2 = smov 12  ;;  %s428_s3 = smov 64   ;;  %v396_v59 = vld [vmem:[%s736_s0 + $0x3] ss:$16 sm:%s283_s26]  }
  0x16   :  { %168 = vrot.lane.b32.xlu0 %v167_v40, %s427_s14  ;;  %v367_v56 = vld [vmem:[%s736_s0 + $0xb] ss:$16 sm:%s120_s20]   ;;  %v118_v57 = vsel %vm10_vm1, %v366_v51, %v113_v55  ;;  %s291_s4 = smov 48  ;;  %s305_s9 = smov 3 }
  0x17   :  { %v123_v58 = vsel %vm14_vm2, %v367_v56, %v118_v57  ;;  %v397_v60 = vld [vmem:[%s736_s0 + $0x3] ss:$16 sm:%s286_s2]   ;;  %s308_s10 = smov 12  ;;  %v391_v63 = vld [vmem:[%s736_s0 + $0x5] ss:$16 sm:%s252_s21]   ;;  %s429_s13 = smov 88  }
  0x18   :  { %190 = vrot.lane.b32.xlu1 %v189_v47, %s428_s3  ;;  %124 = vrot.lane.b32.xlu2 %v123_v58, %s429_s13  ;;  %s296_s14 = smov 192  ;;  %s313_s15 = smov 48  ;;  %v398_v0 = vld [vmem:[%s736_s0 + $0x3] ss:$16 sm:%s291_s4]   ;;  %v289_v2 = vsel %vm6_vm0, %v397_v60, %v396_v59  ;;  %v255_v5 = vsel %vm14_vm2, %v391_v63, %v250_v62 }
  0x19   :  { %v400_v1 = vld [vmem:[%s736_s0 + $0x2] ss:$16 sm:%s305_s9]   ;;  %s129_s20 = smov 3  ;;  %s132_s25 = smov 12  ;;  %v399_v6 = vld [vmem:[%s736_s0 + $0x3] ss:$16 sm:%s296_s14]   ;;  %v294_v12 = vsel %vm10_vm1, %v398_v0, %v289_v2 }
  0x1a   :  { %v401_v3 = vld [vmem:[%s736_s0 + $0x2] ss:$16 sm:%s308_s10]   ;;  %v368_v4 = vld [vmem:[%s736_s0 + $0xa] ss:$16 sm:%s129_s20]   ;;  %s137_s26 = smov 48  ;;  %s430_s27 = smov 48   ;;  %v299_v20 = vsel %vm14_vm2, %v399_v6, %v294_v12 }
  0x1b   :  { %v402_v7 = vld [vmem:[%s736_s0 + $0x2] ss:$16 sm:%s313_s15]   ;;  %s318_s3 = smov 192  ;;  %v369_v8 = vld [vmem:[%s736_s0 + $0xa] ss:$16 sm:%s132_s25]   ;;  %s142_s6 = smov 192  ;;  %v311_v13 = vsel %vm6_vm0, %v401_v3, %v400_v1 }
  0x1c   :  { %v135_v9 = vsel %vm6_vm0, %v369_v8, %v368_v4  ;;  %v370_v10 = vld [vmem:[%s736_s0 + $0xa] ss:$16 sm:%s137_s26]   ;;  %s195_s11 = smov 3  ;;  %s198_s12 = smov 12  ;;  %v316_v21 = vsel %vm10_vm1, %v402_v7, %v311_v13  ;;  %v403_v22 = vld [vmem:[%s736_s0 + $0x2] ss:$16 sm:%s318_s3]  }
  0x1d   :  { %v371_v11 = vld [vmem:[%s736_s0 + $0xa] ss:$16 sm:%s142_s6]   ;;  %v140_v14 = vsel %vm10_vm1, %v370_v10, %v135_v9  ;;  %v380_v15 = vld [vmem:[%s736_s0 + $0x7] ss:$16 sm:%s195_s11]   ;;  %s203_s17 = smov 48  ;;  %s431_s18 = smov 40   ;;  %v321_v25 = vsel %vm14_vm2, %v403_v22, %v316_v21 }
  0x1e   :  { %234 = vrot.lane.b32.xlu0 %v233_v61, %s430_s27  ;;  %v381_v16 = vld [vmem:[%s736_s0 + $0x7] ss:$16 sm:%s198_s12]   ;;  %v145_v17 = vsel %vm14_vm2, %v371_v11, %v140_v14  ;;  %s208_s21 = smov 192  ;;  %s432_s24 = smov 80  }
  0x1f   :  { %v201_v18 = vsel %vm6_vm0, %v381_v16, %v380_v15  ;;  %v382_v19 = vld [vmem:[%s736_s0 + $0x7] ss:$16 sm:%s203_s17]   ;;  %s261_s25 = smov 3  ;;  %s264_s26 = smov 12 }
  0x20   :  { %256 = vrot.lane.b32.xlu1 %v255_v5, %s431_s18  ;;  %146 = vrot.lane.b32.xlu2 %v145_v17, %s432_s24  ;;  %v206_v23 = vsel %vm10_vm1, %v382_v19, %v201_v18  ;;  %v383_v24 = vld [vmem:[%s736_s0 + $0x7] ss:$16 sm:%s208_s21]   ;;  %s433_s29 = smov 24   ;;  %s269_s5 = smov 48 }
  0x21   :  { %v392_v26 = vld [vmem:[%s736_s0 + $0x4] ss:$16 sm:%s261_s25]   ;;  %v211_v28 = vsel %vm14_vm2, %v383_v24, %v206_v23  ;;  %s434_s6 = smov 16   ;;  %s274_s9 = smov 192 }
  0x22   :  { %v393_v27 = vld [vmem:[%s736_s0 + $0x4] ss:$16 sm:%s264_s26]   ;;  %s435_s10 = smov 56   ;;  %s327_s11 = smov 3 }
  0x23   :  { %v267_v29 = vsel %vm6_vm0, %v393_v27, %v392_v26  ;;  %v394_v30 = vld [vmem:[%s736_s0 + $0x4] ss:$16 sm:%s269_s5]   ;;  %s330_s12 = smov 12  ;;  %v404_v33 = vld [vmem:[%s736_s0 + $0x1] ss:$16 sm:%s327_s11]   ;;  %s335_s19 = smov 48 }
  0x24   :  { %v272_v31 = vsel %vm10_vm1, %v394_v30, %v267_v29  ;;  %v395_v32 = vld [vmem:[%s736_s0 + $0x4] ss:$16 sm:%s274_s9]   ;;  %v405_v34 = vld [vmem:[%s736_s0 + $0x1] ss:$16 sm:%s330_s12]   ;;  %s340_s22 = smov 192  ;;  %s436_s23 = smov 32  }
  0x25   :  { %v277_v35 = vsel %vm14_vm2, %v395_v32, %v272_v31  ;;  %v333_v36 = vsel %vm6_vm0, %v405_v34, %v404_v33  ;;  %v406_v37 = vld [vmem:[%s736_s0 + $0x1] ss:$16 sm:%s335_s19]   ;;  %s437_s26 = smov 8   ;;  %s2_s27 = smov 3 }
  0x26   :  { %300 = vrot.lane.b32.xlu0 %v299_v20, %s433_s29  ;;  %v338_v38 = vsel %vm10_vm1, %v406_v37, %v333_v36  ;;  %v407_v39 = vld [vmem:[%s736_s0 + $0x1] ss:$16 sm:%s340_s22]   ;;  %s4_s28 = smov 12  ;;  %s8_s29 = smov 48 }
  0x27   :  { %v343_v40 = vsel %vm14_vm2, %v407_v39, %v338_v38  ;;  %s12_s30 = smov 192  ;;  %v3_v41 = vld [vmem:[%s736_s0] ss:$16 sm:%s2_s27]  }
  0x28   :  { %322 = vrot.lane.b32.xlu1 %v321_v25, %s434_s6  ;;  %212 = vrot.lane.b32.xlu2 %v211_v28, %s435_s10  ;;  %v5_v42 = vld [vmem:[%s736_s0] ss:$16 sm:%s4_s28]  }
  0x29   :  { %v7_v43 = vsel %vm6_vm0, %v5_v42, %v3_v41  ;;  %v9_v44 = vld [vmem:[%s736_s0] ss:$16 sm:%s8_s29]   ;;  %vm302_vm0 = vcmask 261312  }
  0x2a   :  { %v11_v45 = vsel %vm10_vm1, %v9_v44, %v7_v43  ;;  %v13_v46 = vld [vmem:[%s736_s0] ss:$16 sm:%s12_s30]   ;;  %vm324_vm1 = vcmask 195712  }
  0x2b   :  { %v15_v47 = vsel %vm14_vm2, %v13_v46, %v11_v45  ;;  %vm346_vm2 = vcmask 130112  }
  0x2c   :  { %17 = vst.msk [vmem:[%s737_s1] sm:$0xff] %vm16_vm3, %v15_v47  }
  0x30   :  { %278 = vrot.lane.b32.xlu2 %v277_v35, %s436_s23 }
  0x38   :  { %344 = vrot.lane.b32.xlu2 %v343_v40, %s437_s26 }
  0x72   :  { %v125_v48 = vpop.permute.xlu2 %124  }
  0x78   :  { %v37_v49 = vpop.permute.xlu0 %36  }
  0x79   :  { %39 = vst.msk [vmem:[%s737_s1] sm:$0xff] %vm38_vm4, %v37_v49  }
  0x7a   :  { %v81_v50 = vpop.permute.xlu1 %80   ;;  %v147_v51 = vpop.permute.xlu2 %146  }
  0x80   :  { %v59_v52 = vpop.permute.xlu0 %58  }
  0x81   :  { %61 = vst.msk [vmem:[%s737_s1] sm:$0xff] %vm60_vm5, %v59_v52  }
  0x82   :  { %83 = vst.msk [vmem:[%s737_s1] sm:$0xff] %vm82_vm6, %v81_v50   ;;  %v103_v53 = vpop.permute.xlu1 %102   ;;  %v213_v54 = vpop.permute.xlu2 %212  }
  0x83   :  { %105 = vst.msk [vmem:[%s737_s1] sm:$0xff] %vm104_vm7, %v103_v53  }
  0x84   :  { %127 = vst.msk [vmem:[%s737_s1] sm:$0xff] %vm126_vm8, %v125_v48  }
  0x85   :  { %149 = vst.msk [vmem:[%s737_s1] sm:$0xff] %vm148_vm9, %v147_v51  }
  0x88   :  { %v169_v55 = vpop.permute.xlu0 %168  }
  0x89   :  { %171 = vst.msk [vmem:[%s737_s1] sm:$0xff] %vm170_vm10, %v169_v55  }
  0x8a   :  { %v191_v56 = vpop.permute.xlu1 %190   ;;  %v279_v57 = vpop.permute.xlu2 %278  }
  0x8b   :  { %193 = vst.msk [vmem:[%s737_s1] sm:$0xff] %vm192_vm11, %v191_v56  }
  0x8c   :  { %215 = vst.msk [vmem:[%s737_s1] sm:$0xff] %vm214_vm12, %v213_v54  }
  0x90   :  { %v235_v58 = vpop.permute.xlu0 %234  }
  0x91   :  { %237 = vst.msk [vmem:[%s737_s1] sm:$0xff] %vm236_vm13, %v235_v58  }
  0x92   :  { %v257_v59 = vpop.permute.xlu1 %256   ;;  %v345_v60 = vpop.permute.xlu2 %344  }
  0x93   :  { %259 = vst.msk [vmem:[%s737_s1] sm:$0xff] %vm258_vm14, %v257_v59  }
  0x94   :  { %281 = vst.msk [vmem:[%s737_s1] sm:$0xff] %vm280_vm15, %v279_v57  }
  0x98   :  { %v301_v61 = vpop.permute.xlu0 %300  }
  0x99   :  { %303 = vst.msk [vmem:[%s737_s1] sm:$0xff] %vm302_vm0, %v301_v61  }
  0x9a   :  { %v323_v62 = vpop.permute.xlu1 %322  }
  0x9b   :  { %325 = vst.msk [vmem:[%s737_s1] sm:$0xff] %vm324_vm1, %v323_v62  }
  0x9c   :  { %347 = vst.msk [vmem:[%s737_s1] sm:$0xff] %vm346_vm2, %v345_v60  }

// kernel: tile.29
= control target key start
LH: loop header
LB: loop body
LE: loop exit
PB: predicated region body
PF: predicated region fallthrough
CT: control target
= control target key end

     0   :  { %vm6_vm0 = vcmask 1043458   ;;  %s11_s6 = smov 3  ;;  %s14_s7 = smov 12  ;;  %vm8_vm1 = vcmask 31744   ;;  %vm20_vm2 = vcmask 523744   ;;  %vm32_vm3 = vcmask 490944   ;;  %s381_s0 = inlined_call_operand.vmem [shape: f32[4,16,4], index: 0, kind: input, shape index: {}]   ;;  %s382_s1 = inlined_call_operand.vmem [shape: f32[4,64], index: 1, kind: output, shape index: {}]  }
   0x1   :  { %v196_v0 = vld [vmem:[%s381_s0 + $0xf] ss:$16 sm:%s11_s6]   ;;  %s35_s12 = smov 3  ;;  %s38_s15 = smov 12  ;;  %vm44_vm4 = vcmask 458144   ;;  %vm56_vm5 = vcmask 425344  }
   0x2   :  { %v197_v1 = vld [vmem:[%s381_s0 + $0xf] ss:$16 sm:%s14_s7]   ;;  %v200_v3 = vld [vmem:[%s381_s0 + $0xd] ss:$16 sm:%s35_s12]   ;;  %s241_s16 = smov 60   ;;  %s23_s19 = smov 3 }
   0x3   :  { %v17_v2 = vsel %vm6_vm0, %v197_v1, %v196_v0  ;;  %v201_v4 = vld [vmem:[%s381_s0 + $0xd] ss:$16 sm:%s38_s15]   ;;  %s26_s20 = smov 12  ;;  %v198_v6 = vld [vmem:[%s381_s0 + $0xe] ss:$16 sm:%s23_s19]   ;;  %s47_s23 = smov 3 }
   0x4   :  { %18 = vrot.lane.b32.xlu0 %v17_v2, %s241_s16  ;;  %v41_v5 = vsel %vm6_vm0, %v201_v4, %v200_v3  ;;  %s242_s24 = smov 52   ;;  %v199_v7 = vld [vmem:[%s381_s0 + $0xe] ss:$16 sm:%s26_s20]   ;;  %s50_s27 = smov 12  ;;  %vm68_vm6 = vcmask 392544   ;;  %vm80_vm7 = vcmask 359744  }
   0x5   :  { %42 = vrot.lane.b32.xlu1 %v41_v5, %s242_s24  ;;  %v202_v8 = vld [vmem:[%s381_s0 + $0xc] ss:$16 sm:%s47_s23]   ;;  %v29_v10 = vsel %vm6_vm0, %v199_v7, %v198_v6  ;;  %s83_s3 = smov 3  ;;  %s86_s4 = smov 12  ;;  %vm92_vm8 = vcmask 326944   ;;  %vm104_vm9 = vcmask 294144  }
   0x6   :  { %v203_v9 = vld [vmem:[%s381_s0 + $0xc] ss:$16 sm:%s50_s27]   ;;  %s243_s5 = smov 56   ;;  %s95_s6 = smov 3  ;;  %v208_v12 = vld [vmem:[%s381_s0 + $0x9] ss:$16 sm:%s83_s3]  }
   0x7   :  { %v53_v11 = vsel %vm6_vm0, %v203_v9, %v202_v8  ;;  %s98_s7 = smov 12  ;;  %v209_v13 = vld [vmem:[%s381_s0 + $0x9] ss:$16 sm:%s86_s4]   ;;  %s59_s12 = smov 3  ;;  %v210_v16 = vld [vmem:[%s381_s0 + $0x8] ss:$16 sm:%s95_s6]  }
   0x8   :  { %s62_s13 = smov 12  ;;  %s244_s14 = smov 48   ;;  %v204_v14 = vld [vmem:[%s381_s0 + $0xb] ss:$16 sm:%s59_s12]   ;;  %v211_v17 = vld [vmem:[%s381_s0 + $0x8] ss:$16 sm:%s98_s7]   ;;  %v89_v19 = vsel %vm6_vm0, %v209_v13, %v208_v12 }
   0x9   :  { %v205_v15 = vld [vmem:[%s381_s0 + $0xb] ss:$16 sm:%s62_s13]   ;;  %s245_s23 = smov 44   ;;  %s71_s24 = smov 3  ;;  %v101_v20 = vsel %vm6_vm0, %v211_v17, %v210_v16  ;;  %vm116_vm10 = vcmask 261344   ;;  %vm128_vm11 = vcmask 228544  }
   0xa   :  { %v65_v18 = vsel %vm6_vm0, %v205_v15, %v204_v14  ;;  %s119_s25 = smov 3  ;;  %s74_s26 = smov 12  ;;  %v206_v21 = vld [vmem:[%s381_s0 + $0xa] ss:$16 sm:%s71_s24]   ;;  %vm140_vm12 = vcmask 195744   ;;  %vm152_vm13 = vcmask 162944  }
   0xb   :  { %66 = vrot.lane.b32.xlu2 %v65_v18, %s245_s23  ;;  %s122_s27 = smov 12  ;;  %v207_v22 = vld [vmem:[%s381_s0 + $0xa] ss:$16 sm:%s74_s26]   ;;  %s246_s3 = smov 36   ;;  %vm164_vm14 = vcmask 130144   ;;  %vm176_vm15 = vcmask 97344  }
   0xc   :  { %30 = vrot.lane.b32.xlu0 %v29_v10, %s243_s5  ;;  %v214_v23 = vld [vmem:[%s381_s0 + $0x6] ss:$16 sm:%s119_s25]   ;;  %s131_s6 = smov 3  ;;  %s134_s7 = smov 12  ;;  %v77_v25 = vsel %vm6_vm0, %v207_v22, %v206_v21 }
   0xd   :  { %54 = vrot.lane.b32.xlu1 %v53_v11, %s244_s14  ;;  %s247_s8 = smov 32   ;;  %v215_v24 = vld [vmem:[%s381_s0 + $0x6] ss:$16 sm:%s122_s27]   ;;  %s107_s15 = smov 3 }
   0xe   :  { %v216_v26 = vld [vmem:[%s381_s0 + $0x5] ss:$16 sm:%s131_s6]   ;;  %s110_s16 = smov 12  ;;  %v125_v28 = vsel %vm6_vm0, %v215_v24, %v214_v23  ;;  %s248_s17 = smov 40   ;;  %v212_v30 = vld [vmem:[%s381_s0 + $0x7] ss:$16 sm:%s107_s15]  }
   0xf   :  { %v217_v27 = vld [vmem:[%s381_s0 + $0x5] ss:$16 sm:%s134_s7]   ;;  %s155_s18 = smov 3  ;;  %s158_s19 = smov 12  ;;  %v213_v31 = vld [vmem:[%s381_s0 + $0x7] ss:$16 sm:%s110_s16]  }
  0x10   :  { %v137_v29 = vsel %vm6_vm0, %v217_v27, %v216_v26  ;;  %s249_s24 = smov 24   ;;  %v220_v32 = vld [vmem:[%s381_s0 + $0x3] ss:$16 sm:%s155_s18]   ;;  %s167_s27 = smov 3  ;;  %v113_v34 = vsel %vm6_vm0, %v213_v31, %v212_v30 }
  0x11   :  { %s170_s28 = smov 12  ;;  %s250_s29 = smov 20   ;;  %v221_v33 = vld [vmem:[%s381_s0 + $0x3] ss:$16 sm:%s158_s19]   ;;  %v222_v35 = vld [vmem:[%s381_s0 + $0x2] ss:$16 sm:%s167_s27]  }
  0x12   :  { %v223_v36 = vld [vmem:[%s381_s0 + $0x2] ss:$16 sm:%s170_s28]   ;;  %s143_s7 = smov 3  ;;  %v161_v37 = vsel %vm6_vm0, %v221_v33, %v220_v32  ;;  %s251_s9 = smov 28  }
  0x13   :  { %78 = vrot.lane.b32.xlu2 %v77_v25, %s248_s17  ;;  %v173_v38 = vsel %vm6_vm0, %v223_v36, %v222_v35  ;;  %v218_v39 = vld [vmem:[%s381_s0 + $0x4] ss:$16 sm:%s143_s7]   ;;  %s252_s14 = smov 12   ;;  %s253_s15 = smov 8  }
  0x14   :  { %90 = vrot.lane.b32.xlu0 %v89_v19, %s246_s3  ;;  %s179_s16 = smov 3  ;;  %s182_s17 = smov 12 }
  0x15   :  { %102 = vrot.lane.b32.xlu1 %v101_v20, %s247_s8  ;;  %s146_s8 = smov 12  ;;  %s254_s18 = smov 16   ;;  %v224_v42 = vld [vmem:[%s381_s0 + $0x1] ss:$16 sm:%s179_s16]  }
  0x16   :  { %v219_v40 = vld [vmem:[%s381_s0 + $0x4] ss:$16 sm:%s146_s8]   ;;  %v225_v43 = vld [vmem:[%s381_s0 + $0x1] ss:$16 sm:%s182_s17]   ;;  %s255_s23 = smov 4   ;;  %s4_s25 = smov 12 }
  0x17   :  { %v149_v41 = vsel %vm6_vm0, %v219_v40, %v218_v39  ;;  %v185_v44 = vsel %vm6_vm0, %v225_v43, %v224_v42  ;;  %v5_v46 = vld [vmem:[%s381_s0] ss:$16 sm:%s4_s25]  }
  0x1b   :  { %114 = vrot.lane.b32.xlu2 %v113_v34, %s251_s9 }
  0x1c   :  { %126 = vrot.lane.b32.xlu0 %v125_v28, %s249_s24  ;;  %s2_s24 = smov 3 }
  0x1d   :  { %138 = vrot.lane.b32.xlu1 %v137_v29, %s250_s29  ;;  %v3_v45 = vld [vmem:[%s381_s0] ss:$16 sm:%s2_s24]  }
  0x1e   :  { %v7_v47 = vsel %vm6_vm0, %v5_v46, %v3_v45  ;;  %vm188_vm0 = vcmask 64544  }
  0x1f   :  { %9 = vst.msk [vmem:[#allocation0] sm:$0xf] %vm8_vm1, %v7_v47  }
  0x23   :  { %150 = vrot.lane.b32.xlu2 %v149_v41, %s254_s18 }
  0x24   :  { %162 = vrot.lane.b32.xlu0 %v161_v37, %s252_s14 }
  0x25   :  { %174 = vrot.lane.b32.xlu1 %v173_v38, %s253_s15 }
  0x2b   :  { %186 = vrot.lane.b32.xlu2 %v185_v44, %s255_s23 }
  0x65   :  { %v67_v48 = vpop.permute.xlu2 %66  }
  0x6d   :  { %v79_v49 = vpop.permute.xlu2 %78  }
  0x75   :  { %v115_v52 = vpop.permute.xlu2 %114  }
  0x76   :  { %v19_v50 = vpop.permute.xlu0 %18  }
  0x77   :  { %21 = vst.msk [vmem:[#allocation0] sm:$0xf] %vm20_vm2, %v19_v50   ;;  %v43_v51 = vpop.permute.xlu1 %42  }
  0x7d   :  { %v151_v55 = vpop.permute.xlu2 %150  }
  0x7e   :  { %v31_v53 = vpop.permute.xlu0 %30  }
  0x7f   :  { %33 = vst.msk [vmem:[#allocation0] sm:$0xf] %vm32_vm3, %v31_v53   ;;  %v55_v54 = vpop.permute.xlu1 %54  }
  0x80   :  { %45 = vst.msk [vmem:[#allocation0] sm:$0xf] %vm44_vm4, %v43_v51  }
  0x81   :  { %57 = vst.msk [vmem:[#allocation0] sm:$0xf] %vm56_vm5, %v55_v54  }
  0x82   :  { %69 = vst.msk [vmem:[#allocation0] sm:$0xf] %vm68_vm6, %v67_v48  }
  0x83   :  { %81 = vst.msk [vmem:[#allocation0] sm:$0xf] %vm80_vm7, %v79_v49  }
  0x85   :  { %v187_v58 = vpop.permute.xlu2 %186  }
  0x86   :  { %v91_v56 = vpop.permute.xlu0 %90  }
  0x87   :  { %93 = vst.msk [vmem:[#allocation0] sm:$0xf] %vm92_vm8, %v91_v56   ;;  %v103_v57 = vpop.permute.xlu1 %102  }
  0x88   :  { %105 = vst.msk [vmem:[#allocation0] sm:$0xf] %vm104_vm9, %v103_v57  }
  0x89   :  { %117 = vst.msk [vmem:[#allocation0] sm:$0xf] %vm116_vm10, %v115_v52  }
  0x8e   :  { %v127_v59 = vpop.permute.xlu0 %126  }
  0x8f   :  { %129 = vst.msk [vmem:[#allocation0] sm:$0xf] %vm128_vm11, %v127_v59   ;;  %v139_v60 = vpop.permute.xlu1 %138  }
  0x90   :  { %141 = vst.msk [vmem:[#allocation0] sm:$0xf] %vm140_vm12, %v139_v60  }
  0x91   :  { %153 = vst.msk [vmem:[#allocation0] sm:$0xf] %vm152_vm13, %v151_v55  }
  0x96   :  { %v163_v61 = vpop.permute.xlu0 %162  }
  0x97   :  { %165 = vst.msk [vmem:[#allocation0] sm:$0xf] %vm164_vm14, %v163_v61   ;;  %v175_v62 = vpop.permute.xlu1 %174  }
  0x98   :  { %177 = vst.msk [vmem:[#allocation0] sm:$0xf] %vm176_vm15, %v175_v62  }
  0x99   :  { %189 = vst.msk [vmem:[#allocation0] sm:$0xf] %vm188_vm0, %v187_v58  }
  0xa0   :  { %v192_v63 = vld [vmem:[#allocation0] sm:$0xf] }
  0xa1   :  { %195 = vst [vmem:[%s382_s1] sm:$0xf] %v192_v63 }

// kernel: special_block_forward.1
= control target key start
LH: loop header
LB: loop body
LE: loop exit
PB: predicated region body
PF: predicated region fallthrough
CT: control target
= control target key end

     0   :  { %vm32_vm0 = vcmask 523264   ;;  %s715_s19 = smov 64   ;;  %v716_v52 = vmov 0.0   ;;  %vm284_vm1 = vcmask 1040384   ;;  %vm349_vm2 = vcmask 1043456   ;;  %s1232_s0 = inlined_call_operand.vmem [shape: f32[32,64], index: 0, kind: input, shape index: {}]   ;;  %s1233_s1 = inlined_call_operand.vmem [shape: f32[192,192], index: 1, kind: input, shape index: {}]   ;;  %s1234_s5 = inlined_call_operand.vmem [shape: f32[64,4], index: 5, kind: input, shape index: {}]   ;;  %s1235_s6 = inlined_call_operand.vmem [shape: f32[4,64], index: 6, kind: input, shape index: {}]   ;;  %s1236_s3 = inlined_call_operand.vmem [shape: f32[2,4], index: 3, kind: input, shape index: {}]   ;;  %s1237_s2 = inlined_call_operand.vmem [shape: f32[192,128], index: 2, kind: input, shape index: {}]   ;;  %s1238_s7 = inlined_call_operand.vmem [shape: f32[128,8], index: 7, kind: input, shape index: {}]   ;;  %s1239_s8 = inlined_call_operand.vmem [shape: f32[8,128], index: 8, kind: input, shape index: {}]   ;;  %s1240_s4 = inlined_call_operand.vmem [shape: f32[4,8], index: 4, kind: input, shape index: {}]   ;;  %s1241_s9 = inlined_call_operand.vmem [shape: f32[32,128], index: 9, kind: output, shape index: {}]  }
   0x1   :  { %v37_v0 = vld [vmem:[%s1232_s0] sm:$0xff]  ;;  %v38_v1 = vld [vmem:[%s1232_s0 + $0x8] sm:$0xff]  ;;  %v39_v2 = vld [vmem:[%s1232_s0 + $0x10] sm:$0xff]  ;;  %33 = vst.msk [vmem:[#allocation2] sm:$0xff] %vm32_vm0, %v716_v52  ;;  %vm345_vm6 = vcmask 31744   ;;  %vm563_vm7 = vcmask 1041408  }
   0x2   :  { %41 = vst.msk [vmem:[#allocation2 + $0x8] sm:$0xff] %vm32_vm0, %v37_v0  ;;  %v40_v3 = vld [vmem:[%s1232_s0 + $0x18] sm:$0xff]  ;;  %v107_v4 = vld [vmem:[%s1233_s1 + $0xf0] sm:$0xff]  ;;  %v105_v6 = vld [vmem:[%s1233_s1 + $0xe0] sm:$0xff]  ;;  %vm565_vm8 = vcmask 1042432   ;;  %vm633_vm12 = vcmask 64512  }
   0x3   :  { %v108_v5 = vld [vmem:[%s1233_s1 + $0xf8] sm:$0xff]  ;;  %42 = vst.msk [vmem:[#allocation2 + $0x10] sm:$0xff] %vm32_vm0, %v38_v1  ;;  %137 = vmatpush.msra.mxu0 %v107_v4  ;;  %v106_v7 = vld [vmem:[%s1233_s1 + $0xe8] sm:$0xff]  ;;  %v103_v8 = vld [vmem:[%s1233_s1 + $0xd0] sm:$0xff] }
   0x4   :  { %195 = vmatpush.msra.mxu2 %v108_v5  ;;  %43 = vst.msk [vmem:[#allocation2 + $0x28] sm:$0xff] %vm32_vm0, %v39_v2  ;;  %v104_v9 = vld [vmem:[%s1233_s1 + $0xd8] sm:$0xff]  ;;  %v101_v10 = vld [vmem:[%s1233_s1 + $0xc0] sm:$0xff]  ;;  %v102_v11 = vld [vmem:[%s1233_s1 + $0xc8] sm:$0xff] }
   0x5   :  { %44 = vst.msk [vmem:[#allocation2 + $0x30] sm:$0xff] %vm32_vm0, %v40_v3  ;;  %138 = vmatpush.msra.mxu0 %v105_v6  ;;  %v99_v12 = vld [vmem:[%s1233_s1 + $0xb0] sm:$0xff]  ;;  %v100_v13 = vld [vmem:[%s1233_s1 + $0xb8] sm:$0xff]  ;;  %v97_v17 = vld [vmem:[%s1233_s1 + $0xa0] sm:$0xff] }
   0x6   :  { %196 = vmatpush.msra.mxu2 %v106_v7  ;;  %v123_v14 = vld [vmem:[%s1233_s1 + $0x170] sm:$0xff]  ;;  %v124_v16 = vld [vmem:[%s1233_s1 + $0x178] sm:$0xff]  ;;  %v98_v18 = vld [vmem:[%s1233_s1 + $0xa8] sm:$0xff]  ;;  %34 = vst.msk [vmem:[#allocation2 + $0x20] sm:$0xff] %vm32_vm0, %v716_v52 }
   0x7   :  { %139 = vmatpush.msra.mxu0 %v103_v8  ;;  %174 = vmatpush.msra.mxu1 %v123_v14  ;;  %v121_v20 = vld [vmem:[%s1233_s1 + $0x160] sm:$0xff]  ;;  %v122_v21 = vld [vmem:[%s1233_s1 + $0x168] sm:$0xff]  ;;  %v95_v22 = vld [vmem:[%s1233_s1 + $0x90] sm:$0xff]  ;;  %35 = vst.msk [vmem:[#allocation2 + $0x18] sm:$0xff] %vm32_vm0, %v716_v52 }
   0x8   :  { %197 = vmatpush.msra.mxu2 %v104_v9  ;;  %v96_v23 = vld [vmem:[%s1233_s1 + $0x98] sm:$0xff]  ;;  %232 = vmatpush.msra.mxu3 %v124_v16  ;;  %v119_v24 = vld [vmem:[%s1233_s1 + $0x150] sm:$0xff]  ;;  %v93_v26 = vld [vmem:[%s1233_s1 + $0x80] sm:$0xff]  ;;  %36 = vst.msk [vmem:[#allocation2 + $0x38] sm:$0xff] %vm32_vm0, %v716_v52 }
   0x9   :  { %v49_v15 = vld [vmem:[#allocation2 + $0x8] sm:$0xff]  ;;  %140 = vmatpush.msra.mxu0 %v101_v10  ;;  %v120_v25 = vld [vmem:[%s1233_s1 + $0x158] sm:$0xff]  ;;  %175 = vmatpush.msra.mxu1 %v121_v20  ;;  %v117_v29 = vld [vmem:[%s1233_s1 + $0x140] sm:$0xff] }
   0xa   :  { %198 = vmatpush.msra.mxu2 %v102_v11  ;;  %61 = vrot.lane.b32.xlu0 %v49_v15, %s715_s19  ;;  %v94_v27 = vld [vmem:[%s1233_s1 + $0x88] sm:$0xff]  ;;  %v50_v28 = vld [vmem:[#allocation2 + $0x10] sm:$0xff]  ;;  %v92_v31 = vld [vmem:[%s1233_s1 + $0x78] sm:$0xff] }
   0xb   :  { %v51_v19 = vld [vmem:[#allocation2 + $0x28] sm:$0xff]  ;;  %141 = vmatpush.msra.mxu0 %v99_v12  ;;  %233 = vmatpush.msra.mxu3 %v122_v21  ;;  %v91_v30 = vld [vmem:[%s1233_s1 + $0x70] sm:$0xff]  ;;  %v89_v34 = vld [vmem:[%s1233_s1 + $0x60] sm:$0xff] }
   0xc   :  { %199 = vmatpush.msra.mxu2 %v100_v13  ;;  %65 = vrot.lane.b32.xlu1 %v51_v19, %s715_s19  ;;  %v52_v32 = vld [vmem:[#allocation2 + $0x30] sm:$0xff]  ;;  %v118_v33 = vld [vmem:[%s1233_s1 + $0x148] sm:$0xff]  ;;  %v116_v37 = vld [vmem:[%s1233_s1 + $0x138] sm:$0xff] }
   0xd   :  { %142 = vmatpush.msra.mxu0 %v97_v17  ;;  %176 = vmatpush.msra.mxu1 %v119_v24  ;;  %v90_v35 = vld [vmem:[%s1233_s1 + $0x68] sm:$0xff]  ;;  %v115_v36 = vld [vmem:[%s1233_s1 + $0x130] sm:$0xff]  ;;  %v88_v39 = vld [vmem:[%s1233_s1 + $0x58] sm:$0xff] }
   0xe   :  { %200 = vmatpush.msra.mxu2 %v98_v18  ;;  %234 = vmatpush.msra.mxu3 %v120_v25  ;;  %v87_v38 = vld [vmem:[%s1233_s1 + $0x50] sm:$0xff]  ;;  %v113_v40 = vld [vmem:[%s1233_s1 + $0x120] sm:$0xff]  ;;  %v114_v41 = vld [vmem:[%s1233_s1 + $0x128] sm:$0xff] }
   0xf   :  { %143 = vmatpush.msra.mxu0 %v95_v22  ;;  %177 = vmatpush.msra.mxu1 %v117_v29  ;;  %v85_v42 = vld [vmem:[%s1233_s1 + $0x40] sm:$0xff]  ;;  %v86_v43 = vld [vmem:[%s1233_s1 + $0x48] sm:$0xff]  ;;  %v111_v44 = vld [vmem:[%s1233_s1 + $0x110] sm:$0xff] }
  0x10   :  { %201 = vmatpush.msra.mxu2 %v96_v23  ;;  %235 = vmatpush.msra.mxu3 %v118_v33  ;;  %v112_v45 = vld [vmem:[%s1233_s1 + $0x118] sm:$0xff]  ;;  %v83_v46 = vld [vmem:[%s1233_s1 + $0x30] sm:$0xff]  ;;  %v81_v48 = vld [vmem:[%s1233_s1 + $0x20] sm:$0xff] }
  0x11   :  { %144 = vmatpush.msra.mxu0 %v93_v26  ;;  %178 = vmatpush.msra.mxu1 %v115_v36  ;;  %v84_v47 = vld [vmem:[%s1233_s1 + $0x38] sm:$0xff]  ;;  %v82_v49 = vld [vmem:[%s1233_s1 + $0x28] sm:$0xff]  ;;  %v79_v50 = vld [vmem:[%s1233_s1 + $0x10] sm:$0xff] }
  0x12   :  { %202 = vmatpush.msra.mxu2 %v94_v27  ;;  %63 = vrot.lane.b32.xlu0 %v50_v28, %s715_s19  ;;  %v80_v51 = vld [vmem:[%s1233_s1 + $0x18] sm:$0xff]  ;;  %v77_v53 = vld [vmem:[%s1233_s1] sm:$0xff]  ;;  %v78_v55 = vld [vmem:[%s1233_s1 + $0x8] sm:$0xff] }
  0x13   :  { %145 = vmatpush.msra.mxu0 %v91_v30  ;;  %236 = vmatpush.msra.mxu3 %v116_v37  ;;  %v109_v54 = vld [vmem:[%s1233_s1 + $0x100] sm:$0xff]  ;;  %v110_v56 = vld [vmem:[%s1233_s1 + $0x108] sm:$0xff]  ;;  %v54_v58 = vld [vmem:[#allocation2 + $0x11] sm:$0xff] }
  0x14   :  { %203 = vmatpush.msra.mxu2 %v92_v31  ;;  %67 = vrot.lane.b32.xlu1 %v52_v32, %s715_s19  ;;  %v53_v57 = vld [vmem:[#allocation2 + $0x9] sm:$0xff]  ;;  %v56_v60 = vld [vmem:[#allocation2 + $0x31] sm:$0xff]  ;;  %v290_v15 = vld [vmem:[%s1234_s5 + $0x20] sm:$0xff] }
  0x15   :  { %146 = vmatpush.msra.mxu0 %v89_v34  ;;  %179 = vmatpush.msra.mxu1 %v113_v40  ;;  %v55_v59 = vld [vmem:[#allocation2 + $0x29] sm:$0xff]  ;;  %v293_v9 = vld [vmem:[%s1234_s5 + $0x38] sm:$0xff]  ;;  %v286_v20 = vld [vmem:[%s1234_s5] sm:$0xff] }
  0x16   :  { %204 = vmatpush.msra.mxu2 %v90_v35  ;;  %237 = vmatpush.msra.mxu3 %v114_v41  ;;  %v45_v61 = vld [vmem:[#allocation2 + $0x7] sm:$0xff]  ;;  %v46_v0 = vld [vmem:[#allocation2 + $0xf] sm:$0xff]  ;;  %v289_v16 = vld [vmem:[%s1234_s5 + $0x18] sm:$0xff] }
  0x17   :  { %147 = vmatpush.msra.mxu0 %v87_v38  ;;  %180 = vmatpush.msra.mxu1 %v111_v44  ;;  %v47_v4 = vld [vmem:[#allocation2 + $0x27] sm:$0xff]  ;;  %v48_v7 = vld [vmem:[#allocation2 + $0x2f] sm:$0xff] }
  0x18   :  { %205 = vmatpush.msra.mxu2 %v88_v39  ;;  %238 = vmatpush.msra.mxu3 %v112_v45  ;;  %v292_v10 = vld [vmem:[%s1234_s5 + $0x30] sm:$0xff]  ;;  %v291_v12 = vld [vmem:[%s1234_s5 + $0x28] sm:$0xff] }
  0x19   :  { %148 = vmatpush.msra.mxu0 %v85_v42  ;;  %181 = vmatpush.msra.mxu1 %v109_v54  ;;  %v288_v17 = vld [vmem:[%s1234_s5 + $0x10] sm:$0xff]  ;;  %v287_v18 = vld [vmem:[%s1234_s5 + $0x8] sm:$0xff] }
  0x1a   :  { %206 = vmatpush.msra.mxu2 %v86_v43  ;;  %239 = vmatpush.msra.mxu3 %v110_v56 }
  0x1b   :  { %149 = vmatpush.msra.mxu0 %v83_v46  ;;  %693 = vmatmul.msk.f32.vlgmr.msra.gmra.mxu1 %vm32_vm0, %v53_v57 }
  0x1c   :  { %207 = vmatpush.msra.mxu2 %v84_v47  ;;  %697 = vmatmul.msk.f32.vlgmr.msra.gmra.mxu3 %vm32_vm0, %v53_v57 }
  0x1d   :  { %150 = vmatpush.msra.mxu0 %v81_v48  ;;  %305 = vmatpush.msrb.mxu1 %v293_v9 }
  0x1e   :  { %208 = vmatpush.msra.mxu2 %v82_v49 }
  0x1f   :  { %151 = vmatpush.msra.mxu0 %v79_v50  ;;  %306 = vmatpush.msrb.mxu1 %v292_v10 }
  0x20   :  { %209 = vmatpush.msra.mxu2 %v80_v51 }
  0x21   :  { %152 = vmatpush.msra.mxu0 %v77_v53  ;;  %307 = vmatpush.msrb.mxu1 %v291_v12 }
  0x22   :  { %210 = vmatpush.msra.mxu2 %v78_v55 }
  0x23   :  { %694 = vmatmul.msk.f32.gmra.mxu1 %vm32_vm0, %v54_v58 }
  0x24   :  { %698 = vmatmul.msk.f32.gmra.mxu3 %vm32_vm0, %v54_v58  ;;  %308 = vmatpush.msrb.mxu1 %v290_v15 }
  0x26   :  { %309 = vmatpush.msrb.mxu1 %v289_v16 }
  0x28   :  { %310 = vmatpush.msrb.mxu1 %v288_v17 }
  0x2a   :  { %311 = vmatpush.msrb.mxu1 %v287_v18 }
  0x2b   :  { %695 = vmatmul.msk.f32.gmra.mxu1 %vm32_vm0, %v55_v59 }
  0x2c   :  { %699 = vmatmul.msk.f32.gmra.mxu3 %vm32_vm0, %v55_v59  ;;  %312 = vmatpush.msrb.mxu1 %v286_v20 }
  0x33   :  { %696 = vmatmul.msk.f32.gmra.mxu1 %vm32_vm0, %v56_v60 }
  0x34   :  { %700 = vmatmul.msk.f32.gmra.mxu3 %vm32_vm0, %v56_v60 }
  0x7c   :  { %v62_v62 = vpop.permute.xlu0 %61 }
  0x7d   :  { %v73_v63 = vsel %vm32_vm0, %v45_v61, %v62_v62 }
  0x7e   :  { %153 = vmatmul.f32.vlgmr.msra.gmra.mxu0 %v73_v63  ;;  %211 = vmatmul.f32.vlgmr.msra.gmra.mxu2 %v73_v63  ;;  %v66_v3 = vpop.permute.xlu1 %65 }
  0x7f   :  { %v75_v5 = vsel %vm32_vm0, %v47_v4, %v66_v3  ;;  %v344_v4 = vld [vmem:[%s1235_s6] sm:$0xf] }
  0x80   :  { %702 = vmatpush.msk.msrb.mxu3 %vm349_vm2, %v344_v4  ;;  %v425_v4 = vld [vmem:[%s1237_s2 + $0x10] sm:$0xff] }
  0x84   :  { %v64_v1 = vpop.permute.xlu0 %63 }
  0x85   :  { %v74_v2 = vsel %vm32_vm0, %v46_v0, %v64_v1 }
  0x86   :  { %156 = vmatmul.f32.gmra.mxu0 %v74_v2  ;;  %214 = vmatmul.f32.gmra.mxu2 %v74_v2  ;;  %v68_v6 = vpop.permute.xlu1 %67 }
  0x87   :  { %v76_v8 = vsel %vm32_vm0, %v48_v7, %v68_v6 }
  0x8e   :  { %159 = vmatmul.f32.gmra.mxu0 %v75_v5  ;;  %217 = vmatmul.f32.gmra.mxu2 %v75_v5 }
  0x96   :  { %162 = vmatmul.f32.gmra.mxu0 %v76_v8  ;;  %220 = vmatmul.f32.gmra.mxu2 %v76_v8 }
  0x98   :  { %v1001_v60 = vpop.f32.mrf.mxu1 }
  0x9f   :  { %v241_v11 = vpop.f32.mrf.mxu3 }
  0xa0   :  { %v1003_v61 = vpop.f32.mrf.mxu1 }
  0xa7   :  { %v244_v14 = vpop.f32.mrf.mxu3 }
  0xa8   :  { %v1005_v62 = vpop.f32.mrf.mxu1 }
  0xaf   :  { %v247_v21 = vpop.f32.mrf.mxu3 }
  0xb0   :  { %v1007_v63 = vpop.f32.mrf.mxu1 }
  0xb7   :  { %v250_v30 = vpop.f32.mrf.mxu3 }
 0x101   :  { %v212_v13 = vpop.f32.mrf.mxu2 }
 0x102   :  { %v973_v24 = vadd.f32 %v241_v11, %v212_v13  ;;  %v253_v13 = vld [vmem:[%s1236_s3] sm:$0x3] }
 0x104   :  { %v267_v27 = vmul.f32 %v973_v24, %v973_v24  ;;  %v254_v31 = vsel %vm32_vm0, %v973_v24, 0.0 }
 0x106   :  { %v271_v36 = vsel %vm32_vm0, %v267_v27, 0.0  ;;  %v443_v27 = vld [vmem:[%s1237_s2 + $0xa0] sm:$0xff] }
 0x109   :  { %v215_v19 = vpop.f32.mrf.mxu2 }
 0x10a   :  { %v971_v22 = vadd.f32 %v244_v14, %v215_v19 }
 0x10c   :  { %v268_v26 = vmul.f32 %v971_v22, %v971_v22  ;;  %v255_v28 = vsel %vm32_vm0, %v971_v22, 0.0 }
 0x10d   :  { %v256_v34 = vadd.f32 %v255_v28, %v254_v31  ;;  %v442_v28 = vld [vmem:[%s1237_s2 + $0x98] sm:$0xff]  ;;  %v439_v31 = vld [vmem:[%s1237_s2 + $0x80] sm:$0xff] }
 0x10e   :  { %v272_v32 = vsel %vm32_vm0, %v268_v26, 0.0  ;;  %v444_v26 = vld [vmem:[%s1237_s2 + $0xa8] sm:$0xff] }
 0x10f   :  { %v273_v39 = vadd.f32 %v272_v32, %v271_v36 }
 0x111   :  { %v218_v23 = vpop.f32.mrf.mxu2 }
 0x112   :  { %v975_v25 = vadd.f32 %v247_v21, %v218_v23  ;;  %v446_v21 = vld [vmem:[%s1237_s2 + $0xb8] sm:$0xff]  ;;  %v445_v23 = vld [vmem:[%s1237_s2 + $0xb0] sm:$0xff] }
 0x113   :  { %496 = vmatpush.msra.mxu1 %v446_v21 }
 0x114   :  { %v269_v29 = vmul.f32 %v975_v25, %v975_v25  ;;  %v257_v33 = vsel %vm32_vm0, %v975_v25, 0.0 }
 0x115   :  { %v258_v40 = vadd.f32 %v257_v33, %v256_v34  ;;  %497 = vmatpush.msra.mxu1 %v445_v23  ;;  %v582_v23 = vld [vmem:[%s1238_s7 + $0x78] sm:$0xff] }
 0x116   :  { %v274_v37 = vsel %vm32_vm0, %v269_v29, 0.0  ;;  %v441_v29 = vld [vmem:[%s1237_s2 + $0x90] sm:$0xff]  ;;  %583 = vmatpush.msrb.mxu2 %v582_v23 }
 0x117   :  { %v275_v43 = vadd.f32 %v274_v37, %v273_v39  ;;  %498 = vmatpush.msra.mxu1 %v444_v26 }
 0x119   :  { %v221_v35 = vpop.f32.mrf.mxu2  ;;  %499 = vmatpush.msra.mxu1 %v443_v27  ;;  %v581_v27 = vld [vmem:[%s1238_s7 + $0x70] sm:$0xff] }
 0x11a   :  { %v992_v38 = vadd.f32 %v250_v30, %v221_v35  ;;  %v440_v30 = vld [vmem:[%s1237_s2 + $0x88] sm:$0xff]  ;;  %584 = vmatpush.msrb.mxu2 %v581_v27 }
 0x11b   :  { %500 = vmatpush.msra.mxu1 %v442_v28  ;;  %v580_v28 = vld [vmem:[%s1238_s7 + $0x68] sm:$0xff] }
 0x11c   :  { %v259_v41 = vsel %vm32_vm0, %v992_v38, 0.0  ;;  %v270_v42 = vmul.f32 %v992_v38, %v992_v38  ;;  %585 = vmatpush.msrb.mxu2 %v580_v28 }
 0x11d   :  { %v260_v44 = vadd.f32 %v259_v41, %v258_v40  ;;  %501 = vmatpush.msra.mxu1 %v441_v29  ;;  %v579_v29 = vld [vmem:[%s1238_s7 + $0x60] sm:$0xff] }
 0x11e   :  { %v276_v45 = vsel %vm32_vm0, %v270_v42, 0.0  ;;  %586 = vmatpush.msrb.mxu2 %v579_v29 }
 0x11f   :  { %v261_v46 = vrot.slane %v260_v44, 4  ;;  %v277_v47 = vadd.f32 %v276_v45, %v275_v43  ;;  %502 = vmatpush.msra.mxu1 %v440_v30 }
 0x121   :  { %v262_v48 = vadd.f32 %v261_v46, %v260_v44  ;;  %v278_v49 = vrot.slane %v277_v47, 4  ;;  %503 = vmatpush.msra.mxu1 %v439_v31  ;;  %v578_v31 = vld [vmem:[%s1238_s7 + $0x58] sm:$0xff] }
 0x122   :  { %587 = vmatpush.msrb.mxu2 %v578_v31 }
 0x123   :  { %v263_v50 = vrot.slane %v262_v48, 2  ;;  %v279_v51 = vadd.f32 %v278_v49, %v277_v47  ;;  %v434_v49 = vld [vmem:[%s1237_s2 + $0x58] sm:$0xff] }
 0x125   :  { %v264_v52 = vadd.f32 %v263_v50, %v262_v48  ;;  %v280_v53 = vrot.slane %v279_v51, 2 }
 0x127   :  { %v265_v54 = vrot.slane %v264_v52, 1  ;;  %v281_v55 = vadd.f32 %v280_v53, %v279_v51 }
 0x129   :  { %v282_v56 = vrot.slane %v281_v55, 1  ;;  %v266_v57 = vadd.f32 %v265_v54, %v264_v52  ;;  %v433_v52 = vld [vmem:[%s1237_s2 + $0x50] sm:$0xff]  ;;  %v432_v54 = vld [vmem:[%s1237_s2 + $0x48] sm:$0xff] }
 0x12b   :  { %v283_v58 = vadd.f32 %v282_v56, %v281_v55  ;;  %v431_v55 = vld [vmem:[%s1237_s2 + $0x40] sm:$0xff] }
 0x12d   :  { %v285_v59 = vsel %vm284_vm1, %v266_v57, %v283_v58  ;;  %v430_v57 = vld [vmem:[%s1237_s2 + $0x38] sm:$0xff] }
 0x12e   :  { %701 = vmatmul.msk.f32.vlgmr.msrb.gmra.mxu1 %vm32_vm0, %v285_v59  ;;  %v429_v59 = vld [vmem:[%s1237_s2 + $0x30] sm:$0xff] }
 0x1ab   :  { %v314_v0 = vpop.f32.mrf.mxu1 }
 0x1ac   :  { %v317_v1 = vmul.f32 0.001953125, %v314_v0  ;;  %v428_v0 = vld [vmem:[%s1237_s2 + $0x28] sm:$0xff] }
 0x1ae   :  { %v318_v2 = vmul.f32 %v317_v1, %v317_v1 }
 0x1b0   :  { %v320_v3 = vrot.slane %v318_v2, 7  ;;  %v426_v2 = vld [vmem:[%s1237_s2 + $0x18] sm:$0xff] }
 0x1b2   :  { %v322_v5 = vsub.f32 %v317_v1, %v320_v3 }
 0x1b4   :  { %v323_v6 = vadd.f32 1e-05, %v322_v5  ;;  %v424_v5 = vld [vmem:[%s1237_s2 + $0x8] sm:$0xff] }
 0x1b6   :  { %711 = vrsqrt.f32 %v323_v6  ;;  %vm330_vm4 = vweird.f32 %v323_v6 }
 0x1bc   :  { %v712_v7 = vpop.eup %711 }
 0x1bd   :  { %v325_v8 = vmul.f32 %v712_v7, %v323_v6  ;;  %vm331_vm3 = vweird.f32 %v712_v7 }
 0x1be   :  { %vm332_vm5 = vmor %vm330_vm4, %vm331_vm3 }
 0x1bf   :  { %v326_v9 = vmul.f32 %v712_v7, %v325_v8 }
 0x1c1   :  { %v327_v10 = vmul.f32 0.5, %v326_v9 }
 0x1c3   :  { %v328_v11 = vsub.f32 1.5, %v327_v10 }
 0x1c5   :  { %v329_v12 = vmul.f32 %v712_v7, %v328_v11 }
 0x1c7   :  { %v333_v14 = vsel %vm332_vm5, %v712_v7, %v329_v12  ;;  %v423_v7 = vld [vmem:[%s1237_s2] sm:$0xff] }
 0x1c8   :  { %v335_v15 = vrot.slane %v333_v14, 1 }
 0x1ca   :  { %v337_v16 = vmul.f32 %v335_v15, %v253_v13 }
 0x1cc   :  { %v338_v17 = vmul.f32 %v337_v16, %v317_v1  ;;  %v427_v1 = vld [vmem:[%s1237_s2 + $0x20] sm:$0xff] }
 0x1ce   :  { %v340_v18 = vrot.slane %v338_v17, 7 }
 0x1d0   :  { %v342_v19 = vsub.f32 %v253_v13, %v340_v18 }
 0x1d2   :  { %v343_v20 = vsel %vm284_vm1, %v337_v16, %v342_v19 }
 0x1d3   :  { %703 = vmatmul.msk.f32.vlgmr.msrb.gmra.mxu3 %vm345_vm6, %v343_v20  ;;  %v154_v20 = vpop.f32.mrf.mxu0 }
 0x1db   :  { %v157_v21 = vpop.f32.mrf.mxu0 }
 0x1e3   :  { %v160_v26 = vpop.f32.mrf.mxu0 }
 0x1eb   :  { %v163_v30 = vpop.f32.mrf.mxu0 }
 0x256   :  { %v370_v32 = vpop.f32.mrf.mxu3 }
 0x257   :  { %v373_v33 = vperm.slane %v370_v32, 0  ;;  %v378_v34 = vperm.slane %v370_v32, 1 }
 0x259   :  { %v374_v35 = vmul.f32 %v373_v33, %v973_v24  ;;  %v375_v36 = vmul.f32 %v373_v33, %v971_v22  ;;  %v376_v37 = vmul.f32 %v373_v33, %v975_v25  ;;  %v377_v39 = vmul.f32 %v373_v33, %v992_v38  ;;  %v438_v22 = vld [vmem:[%s1237_s2 + $0x78] sm:$0xff]  ;;  %v437_v24 = vld [vmem:[%s1237_s2 + $0x70] sm:$0xff]  ;;  %v436_v25 = vld [vmem:[%s1237_s2 + $0x68] sm:$0xff] }
 0x25a   :  { %459 = vmatpush.msrb.mxu0 %v438_v22  ;;  %v435_v38 = vld [vmem:[%s1237_s2 + $0x60] sm:$0xff]  ;;  %v577_v33 = vld [vmem:[%s1238_s7 + $0x50] sm:$0xff]  ;;  %v1157_v22 = vadd.f32 %v1005_v62, %v160_v26 }
 0x25b   :  { %v379_v40 = vadd.f32 %v378_v34, %v374_v35  ;;  %v380_v41 = vadd.f32 %v378_v34, %v375_v36  ;;  %v381_v42 = vadd.f32 %v378_v34, %v376_v37  ;;  %v382_v43 = vadd.f32 %v378_v34, %v377_v39  ;;  %588 = vmatpush.msrb.mxu2 %v577_v33  ;;  %v576_v34 = vld [vmem:[%s1238_s7 + $0x48] sm:$0xff]  ;;  %v575_v36 = vld [vmem:[%s1238_s7 + $0x40] sm:$0xff]  ;;  %v574_v37 = vld [vmem:[%s1238_s7 + $0x38] sm:$0xff] }
 0x25c   :  { %460 = vmatpush.msrb.mxu0 %v437_v24  ;;  %v573_v39 = vld [vmem:[%s1238_s7 + $0x30] sm:$0xff]  ;;  %v568_v24 = vld [vmem:[%s1238_s7 + $0x8] sm:$0xff] }
 0x25d   :  { %v383_v44 = vmax.f32 %v379_v40, 0.0  ;;  %v384_v45 = vmax.f32 %v380_v41, 0.0  ;;  %v385_v46 = vmax.f32 %v381_v42, 0.0  ;;  %v386_v47 = vmax.f32 %v382_v43, 0.0  ;;  %589 = vmatpush.msrb.mxu2 %v576_v34  ;;  %v572_v41 = vld [vmem:[%s1238_s7 + $0x28] sm:$0xff]  ;;  %v571_v42 = vld [vmem:[%s1238_s7 + $0x20] sm:$0xff] }
 0x25e   :  { %461 = vmatpush.msrb.mxu0 %v436_v25  ;;  %v570_v43 = vld [vmem:[%s1238_s7 + $0x18] sm:$0xff]  ;;  %v1165_v25 = vadd.f32 %v1007_v63, %v163_v30 }
 0x25f   :  { %387 = vst.msk [vmem:[#allocation2 + $0x8] sm:$0xff] %vm32_vm0, %v383_v44  ;;  %590 = vmatpush.msrb.mxu2 %v575_v36  ;;  %v1148_v44 = vadd.f32 %v1003_v61, %v157_v21 }
 0x260   :  { %388 = vst.msk [vmem:[#allocation2 + $0x10] sm:$0xff] %vm32_vm0, %v384_v45  ;;  %462 = vmatpush.msrb.mxu0 %v435_v38  ;;  %v551_v38 = vmul.f32 %v1157_v22, %v1157_v22  ;;  %v552_v63 = vmul.f32 %v1165_v25, %v1165_v25 }
 0x261   :  { %389 = vst.msk [vmem:[#allocation2 + $0x28] sm:$0xff] %vm32_vm0, %v385_v46  ;;  %591 = vmatpush.msrb.mxu2 %v574_v37  ;;  %v569_v46 = vld [vmem:[%s1238_s7 + $0x10] sm:$0xff]  ;;  %v550_v61 = vmul.f32 %v1148_v44, %v1148_v44 }
 0x262   :  { %390 = vst.msk [vmem:[#allocation2 + $0x30] sm:$0xff] %vm32_vm0, %v386_v47  ;;  %463 = vmatpush.msrb.mxu0 %v434_v49  ;;  %v1154_v47 = vadd.f32 %v1001_v60, %v154_v20  ;;  %v567_v60 = vld [vmem:[%s1238_s7] sm:$0xff] }
 0x263   :  { %592 = vmatpush.msrb.mxu2 %v573_v39 }
 0x264   :  { %464 = vmatpush.msrb.mxu0 %v433_v52  ;;  %v549_v62 = vmul.f32 %v1154_v47, %v1154_v47 }
 0x265   :  { %593 = vmatpush.msrb.mxu2 %v572_v41 }
 0x266   :  { %v395_v48 = vld [vmem:[#allocation2 + $0x8] sm:$0xff]  ;;  %465 = vmatpush.msrb.mxu0 %v432_v54 }
 0x267   :  { %v399_v50 = vld [vmem:[#allocation2 + $0x9] sm:$0xff]  ;;  %407 = vrot.lane.b32.xlu2 %v395_v48, %s715_s19  ;;  %v400_v58 = vld [vmem:[#allocation2 + $0x11] sm:$0xff]  ;;  %594 = vmatpush.msrb.mxu2 %v571_v42  ;;  %v540_v48 = vadd.f32 %v1148_v44, %v1154_v47 }
 0x268   :  { %v397_v51 = vld [vmem:[#allocation2 + $0x28] sm:$0xff]  ;;  %704 = vmatmul.msk.f32.vlgmr.msra.gmra.mxu1 %vm32_vm0, %v399_v50  ;;  %v396_v56 = vld [vmem:[#allocation2 + $0x10] sm:$0xff]  ;;  %466 = vmatpush.msrb.mxu0 %v431_v55  ;;  %v553_v50 = vadd.f32 %v550_v61, %v549_v62  ;;  %v632_v61 = vld [vmem:[%s1239_s8] sm:$0xff] }
 0x269   :  { %v398_v53 = vld [vmem:[#allocation2 + $0x30] sm:$0xff]  ;;  %411 = vrot.lane.b32.xlu0 %v397_v51, %s715_s19  ;;  %v391_v9 = vld [vmem:[#allocation2 + $0x7] sm:$0xff]  ;;  %595 = vmatpush.msrb.mxu2 %v570_v43  ;;  %v541_v51 = vadd.f32 %v540_v48, %v1157_v22 }
 0x26a   :  { %413 = vrot.lane.b32.xlu1 %v398_v53, %s715_s19  ;;  %467 = vmatpush.msrb.mxu0 %v430_v57  ;;  %v401_v3 = vld [vmem:[#allocation2 + $0x29] sm:$0xff]  ;;  %v402_v6 = vld [vmem:[#allocation2 + $0x31] sm:$0xff]  ;;  %v554_v53 = vadd.f32 %v553_v50, %v551_v38 }
 0x26b   :  { %v392_v12 = vld [vmem:[#allocation2 + $0xf] sm:$0xff]  ;;  %v393_v15 = vld [vmem:[#allocation2 + $0x27] sm:$0xff]  ;;  %596 = vmatpush.msrb.mxu2 %v569_v46  ;;  %v542_v55 = vadd.f32 %v541_v51, %v1165_v25  ;;  %652 = vmatpush.msra.mxu3 %v632_v61 }
 0x26c   :  { %468 = vmatpush.msrb.mxu0 %v429_v59  ;;  %v394_v18 = vld [vmem:[#allocation2 + $0x2f] sm:$0xff] }
 0x26d   :  { %597 = vmatpush.msrb.mxu2 %v568_v24 }
 0x26e   :  { %469 = vmatpush.msrb.mxu0 %v428_v0  ;;  %v543_v0 = vrot.slane %v542_v55, 4 }
 0x26f   :  { %409 = vrot.lane.b32.xlu2 %v396_v56, %s715_s19  ;;  %598 = vmatpush.msrb.mxu2 %v567_v60  ;;  %v555_v56 = vadd.f32 %v554_v53, %v552_v63 }
 0x270   :  { %705 = vmatmul.msk.f32.gmra.mxu1 %vm32_vm0, %v400_v58  ;;  %470 = vmatpush.msrb.mxu0 %v427_v1 }
 0x271   :  { %v556_v1 = vrot.slane %v555_v56, 4 }
 0x272   :  { %471 = vmatpush.msrb.mxu0 %v426_v2 }
 0x274   :  { %472 = vmatpush.msrb.mxu0 %v425_v4 }
 0x276   :  { %473 = vmatpush.msrb.mxu0 %v424_v5 }
 0x278   :  { %706 = vmatmul.msk.f32.gmra.mxu1 %vm32_vm0, %v401_v3  ;;  %474 = vmatpush.msrb.mxu0 %v423_v7 }
 0x280   :  { %707 = vmatmul.msk.f32.gmra.mxu1 %vm32_vm0, %v402_v6 }
 0x2c1   :  { %v408_v8 = vpop.permute.xlu2 %407 }
 0x2c2   :  { %v419_v10 = vsel %vm32_vm0, %v391_v9, %v408_v8 }
 0x2c3   :  { %475 = vmatmul.f32.vlgmr.msrb.gmra.mxu0 %v419_v10  ;;  %v544_v10 = vadd.f32 %v543_v0, %v542_v55 }
 0x2c9   :  { %v410_v11 = vpop.permute.xlu2 %409 }
 0x2ca   :  { %v420_v13 = vsel %vm32_vm0, %v392_v12, %v410_v11  ;;  %v557_v11 = vadd.f32 %v556_v1, %v555_v56 }
 0x2cb   :  { %478 = vmatmul.f32.gmra.mxu0 %v420_v13 }
 0x2cc   :  { %v558_v20 = vrot.slane %v557_v11, 2 }
 0x2ce   :  { %v559_v29 = vadd.f32 %v558_v20, %v557_v11 }
 0x2d0   :  { %v560_v34 = vrot.slane %v559_v29, 1 }
 0x2d2   :  { %v561_v39 = vadd.f32 %v560_v34, %v559_v29 }
 0x2db   :  { %v412_v14 = vpop.permute.xlu0 %411 }
 0x2dc   :  { %v421_v16 = vsel %vm32_vm0, %v393_v15, %v412_v14  ;;  %v414_v17 = vpop.permute.xlu1 %413 }
 0x2dd   :  { %481 = vmatmul.f32.gmra.mxu0 %v421_v16  ;;  %v422_v19 = vsel %vm32_vm0, %v394_v18, %v414_v17  ;;  %v545_v17 = vrot.slane %v544_v10, 2 }
 0x2df   :  { %v546_v26 = vadd.f32 %v545_v17, %v544_v10 }
 0x2e5   :  { %484 = vmatmul.f32.gmra.mxu0 %v422_v19  ;;  %v505_v32 = vpop.f32.mrf.mxu1 }
 0x2ed   :  { %v508_v40 = vpop.f32.mrf.mxu1 }
 0x2f5   :  { %v511_v49 = vpop.f32.mrf.mxu1 }
 0x2fd   :  { %v514_v5 = vpop.f32.mrf.mxu1 }
 0x340   :  { %v476_v35 = vpop.f32.mrf.mxu0 }
 0x341   :  { %v1182_v57 = vadd.f32 %v505_v32, %v476_v35  ;;  %v547_v32 = vrot.slane %v546_v26, 1 }
 0x343   :  { %v527_v2 = vmul.f32 %v1182_v57, %v1182_v57  ;;  %v548_v37 = vadd.f32 %v547_v32, %v546_v26 }
 0x348   :  { %v479_v45 = vpop.f32.mrf.mxu0 }
 0x349   :  { %v1179_v54 = vadd.f32 %v508_v40, %v479_v45 }
 0x34b   :  { %v528_v59 = vmul.f32 %v1179_v54, %v1179_v54  ;;  %v518_v3 = vadd.f32 %v1179_v54, %v1182_v57 }
 0x34d   :  { %v531_v7 = vadd.f32 %v528_v59, %v527_v2 }
 0x35a   :  { %v482_v52 = vpop.f32.mrf.mxu0 }
 0x35b   :  { %v1184_v58 = vadd.f32 %v511_v49, %v482_v52  ;;  %v517_v52 = vld [vmem:[%s1240_s4] sm:$0xf] }
 0x35d   :  { %v529_v4 = vmul.f32 %v1184_v58, %v1184_v58  ;;  %v519_v8 = vadd.f32 %v518_v3, %v1184_v58 }
 0x35f   :  { %v532_v12 = vadd.f32 %v531_v7, %v529_v4 }
 0x362   :  { %v485_v6 = vpop.f32.mrf.mxu0 }
 0x363   :  { %v1195_v9 = vadd.f32 %v514_v5, %v485_v6 }
 0x365   :  { %v520_v13 = vadd.f32 %v519_v8, %v1195_v9  ;;  %v530_v14 = vmul.f32 %v1195_v9, %v1195_v9 }
 0x367   :  { %v521_v15 = vrot.slane %v520_v13, 4  ;;  %v533_v16 = vadd.f32 %v532_v12, %v530_v14 }
 0x369   :  { %v522_v18 = vadd.f32 %v521_v15, %v520_v13  ;;  %v534_v19 = vrot.slane %v533_v16, 4 }
 0x36b   :  { %v523_v21 = vrot.slane %v522_v18, 2  ;;  %v535_v23 = vadd.f32 %v534_v19, %v533_v16 }
 0x36d   :  { %v524_v27 = vadd.f32 %v523_v21, %v522_v18  ;;  %v536_v28 = vrot.slane %v535_v23, 2 }
 0x36f   :  { %v525_v30 = vrot.slane %v524_v27, 1  ;;  %v537_v31 = vadd.f32 %v536_v28, %v535_v23 }
 0x371   :  { %v538_v33 = vrot.slane %v537_v31, 1  ;;  %v526_v35 = vadd.f32 %v525_v30, %v524_v27 }
 0x373   :  { %v539_v36 = vadd.f32 %v538_v33, %v537_v31 }
 0x375   :  { %v562_v40 = vsel %vm284_vm1, %v526_v35, %v539_v36 }
 0x376   :  { %v564_v41 = vsel %vm563_vm7, %v562_v40, %v548_v37 }
 0x377   :  { %v566_v42 = vsel %vm565_vm8, %v564_v41, %v561_v39 }
 0x378   :  { %599 = vmatmul.f32.vlgmr.msrb.gmra.mxu2 %v566_v42 }
 0x3fb   :  { %v600_v43 = vpop.f32.mrf.mxu2 }
 0x3fc   :  { %v603_v45 = vmul.f32 0.001953125, %v600_v43 }
 0x3fe   :  { %v604_v46 = vmul.f32 %v603_v45, %v603_v45 }
 0x400   :  { %v606_v24 = vrot.slane %v604_v46, 7 }
 0x402   :  { %v608_v60 = vsub.f32 %v603_v45, %v606_v24 }
 0x404   :  { %v609_v62 = vadd.f32 1e-05, %v608_v60 }
 0x406   :  { %713 = vrsqrt.f32 %v609_v62  ;;  %vm616_vm10 = vweird.f32 %v609_v62 }
 0x40c   :  { %v714_v38 = vpop.eup %713 }
 0x40d   :  { %v611_v48 = vmul.f32 %v714_v38, %v609_v62  ;;  %vm617_vm9 = vweird.f32 %v714_v38 }
 0x40e   :  { %vm618_vm11 = vmor %vm616_vm10, %vm617_vm9 }
 0x40f   :  { %v612_v49 = vmul.f32 %v714_v38, %v611_v48 }
 0x411   :  { %v613_v50 = vmul.f32 0.5, %v612_v49 }
 0x413   :  { %v614_v63 = vsub.f32 1.5, %v613_v50 }
 0x415   :  { %v615_v51 = vmul.f32 %v714_v38, %v614_v63 }
 0x417   :  { %v619_v53 = vsel %vm618_vm11, %v714_v38, %v615_v51 }
 0x418   :  { %v621_v55 = vrot.slane %v619_v53, 1 }
 0x41a   :  { %v623_v56 = vmul.f32 %v621_v55, %v517_v52 }
 0x41c   :  { %v624_v59 = vmul.f32 %v623_v56, %v603_v45 }
 0x41e   :  { %v626_v0 = vrot.slane %v624_v59, 7 }
 0x420   :  { %v628_v1 = vsub.f32 %v517_v52, %v626_v0 }
 0x422   :  { %v629_v2 = vsel %vm284_vm1, %v623_v56, %v628_v1 }
 0x423   :  { %v630_v3 = vsel %vm563_vm7, %v629_v2, %v623_v56 }
 0x424   :  { %v631_v4 = vsel %vm565_vm8, %v630_v3, %v628_v1 }
 0x425   :  { %708 = vmatmul.msk.f32.vlgmr.msra.gmra.mxu3 %vm633_vm12, %v631_v4 }
 0x4a8   :  { %v654_v5 = vpop.f32.mrf.mxu3 }
 0x4a9   :  { %v657_v6 = vperm.slane %v654_v5, 0  ;;  %v667_v7 = vperm.slane %v654_v5, 2  ;;  %v662_v8 = vperm.slane %v654_v5, 1  ;;  %v672_v10 = vperm.slane %v654_v5, 3 }
 0x4ab   :  { %v658_v11 = vmul.f32 %v657_v6, %v1182_v57  ;;  %v659_v12 = vmul.f32 %v657_v6, %v1179_v54  ;;  %v660_v13 = vmul.f32 %v657_v6, %v1184_v58  ;;  %v661_v14 = vmul.f32 %v657_v6, %v1195_v9 }
 0x4ac   :  { %v668_v15 = vmul.f32 %v667_v7, %v1154_v47  ;;  %v669_v16 = vmul.f32 %v667_v7, %v1148_v44  ;;  %v670_v17 = vmul.f32 %v667_v7, %v1157_v22  ;;  %v671_v18 = vmul.f32 %v667_v7, %v1165_v25 }
 0x4ad   :  { %v663_v19 = vadd.f32 %v662_v8, %v658_v11  ;;  %v664_v20 = vadd.f32 %v662_v8, %v659_v12  ;;  %v665_v21 = vadd.f32 %v662_v8, %v660_v13  ;;  %v666_v23 = vadd.f32 %v662_v8, %v661_v14 }
 0x4ae   :  { %v673_v26 = vadd.f32 %v672_v10, %v668_v15  ;;  %v674_v57 = vadd.f32 %v672_v10, %v669_v16  ;;  %v675_v27 = vadd.f32 %v672_v10, %v670_v17  ;;  %v676_v54 = vadd.f32 %v672_v10, %v671_v18 }
 0x4b0   :  { %v677_v28 = vadd.f32 %v673_v26, %v663_v19  ;;  %v678_v58 = vadd.f32 %v674_v57, %v664_v20  ;;  %v679_v29 = vadd.f32 %v675_v27, %v665_v21  ;;  %v680_v9 = vadd.f32 %v676_v54, %v666_v23 }
 0x4b2   :  { %v681_v30 = vmax.f32 %v677_v28, 0.0  ;;  %v682_v47 = vmax.f32 %v678_v58, 0.0  ;;  %v683_v31 = vmax.f32 %v679_v29, 0.0  ;;  %v684_v44 = vmax.f32 %v680_v9, 0.0 }
 0x4b4   :  { %685 = vst [vmem:[%s1241_s9] sm:$0xff] %v681_v30 }
 0x4b5   :  { %686 = vst [vmem:[%s1241_s9 + $0x8] sm:$0xff] %v682_v47 }
 0x4b6   :  { %687 = vst [vmem:[%s1241_s9 + $0x10] sm:$0xff] %v683_v31 }
 0x4b7   :  { %688 = vst [vmem:[%s1241_s9 + $0x18] sm:$0xff] %v684_v44 }

</bundles_post_ra>
